<compile_context>
chip_gen: v6e
topology: v6e:2x2x1
jax: 0.10.0
libtpu: 0.0.40
codegen_flags: <defaults>
</compile_context>

<pallas_src>
import functools

import numpy as np
import jax
import jax.numpy as jnp
from jax.experimental import pallas as pl
from jax.experimental.pallas import tpu as pltpu


# ----------------------------------------------------------------------------
# In-kernel helpers
# ----------------------------------------------------------------------------
def _layer_norm(x, gamma, beta, eps=1e-6):
    # Single-pass LayerNorm over the last dim (biased variance), matching
    # nn.LayerNorm(d_model, eps=1e-06). sum(x) and sum(x*x) are independent
    # reductions (no dependent (x-mean)^2 second pass).
    inv_d = 1.0 / x.shape[-1]
    mean = jnp.sum(x, axis=-1, keepdims=True) * inv_d
    mean_sq = jnp.sum(x * x, axis=-1, keepdims=True) * inv_d
    var = jnp.maximum(mean_sq - mean * mean, 0.0)
    return (x - mean) * jax.lax.rsqrt(var + eps) * gamma + beta


# ----------------------------------------------------------------------------
# Fused kernel: embeddings + pos-enc + LayerNorm + all encoder layers
# (one grid step == one batch element; activation rows = S)
# ----------------------------------------------------------------------------
def action_encoder_kernel(n_layers, n_head, d_k, d_v, seq,
                          idx_ref, emb_ref, pos_ref, ln_g_ref, ln_b_ref,
                          wqkv_ref, wfc_ref, ln1_g_ref, ln1_b_ref,
                          w1_ref, b1_ref, w2_ref, b2_ref,
                          ln2_g_ref, ln2_b_ref, o_ref):
    bf16 = jnp.bfloat16
    f32 = jnp.float32
    S = seq
    H, dk, dv = n_head, d_k, d_v

    # ---- fused 4-way embedding lookup: ONE multi-hot matmul ----------------
    # idx_ref is (S, 4) int32 with the per-column vocab offsets already added,
    # so the 4 one-hots land in disjoint column ranges of the concatenated
    # table; a single multi-hot (S, V) @ (V, E) matmul therefore returns the
    # SUM of the four embeddings (replaces 4 gathers + 3 adds).
    V = emb_ref.shape[0]
    iota = jax.lax.broadcasted_iota(jnp.int32, (S, V), 1)
    multihot = jnp.zeros((S, V), f32)
    for c in range(idx_ref.shape[1]):
        multihot = multihot + (idx_ref[:, c:c + 1] == iota).astype(f32)
    # HIGHEST precision keeps the f32 embedding values exact (parity with
    # nn.Embedding); the matmul is tiny so the extra MXU passes are free.
    x = jnp.dot(multihot, emb_ref[...],
                preferred_element_type=f32,
                precision=jax.lax.Precision.HIGHEST)          # (S, E)

    # ---- positional encoding + LayerNorm ------------------------------------
    x = x + pos_ref[...]                                       # (S, E)
    # TODO(synk): nn.Dropout(p=0.1) — identity in eval mode, omitted here.
    x = _layer_norm(x, ln_g_ref[...], ln_b_ref[...])           # (S, D) f32

    # ---- encoder layers (post-norm MHA + FFN), static unroll ----------------
    def head_batch(mat, off, width):
        # (S, n*width) lanes -> (n_head, S, width): static lane slices stacked
        # on the leading (batch) dim — avoids a (S,H,d)->(H,S,d) sublane
        # transpose while still letting scores/contexts run as ONE batched
        # einsum over all heads.
        parts = [mat[:, off + h * width: off + (h + 1) * width]
                 .reshape(1, S, width) for h in range(H)]
        return jnp.concatenate(parts, axis=0)

    for l in range(n_layers):
        residual = x

        # single fused QKV projection (1/sqrt(d_k) pre-folded into Q columns);
        # one bf16 cast of the result reused for every head slice.
        qkv = jnp.dot(x.astype(bf16), wqkv_ref[l],
                      preferred_element_type=f32)              # (S, H*(2dk+dv))
        qkvb = qkv.astype(bf16)
        qh = head_batch(qkvb, 0, dk)                           # (H, S, dk)
        kh = head_batch(qkvb, H * dk, dk)                      # (H, S, dk)
        vh = head_batch(qkvb, 2 * H * dk, dv)                  # (H, S, dv)

        # all heads in one batched matmul each (batch dim = H)
        s = jnp.einsum('hqd,hkd->hqk', qh, kh,
                       preferred_element_type=f32)             # (H, S, S)
        # pad_mask=None in this forward -> no masking; softmax in f32.
        s = s - jnp.max(s, axis=-1, keepdims=True)
        p = jnp.exp(s)
        p = p * pl.reciprocal(jnp.sum(p, axis=-1, keepdims=True), approx=True)
        ctx = jnp.einsum('hqk,hkd->hqd', p.astype(bf16), vh,
                         preferred_element_type=f32)           # (H, S, dv)

        # concat heads on the lane dim, single output projection.
        ctx2 = jnp.concatenate([ctx[h] for h in range(H)], axis=-1)  # (S, H*dv)
        attn = jnp.dot(ctx2.astype(bf16), wfc_ref[l],
                       preferred_element_type=f32)             # (S, D)
        # TODO(synk): attention-output dropout — identity in eval mode.
        x = _layer_norm(attn + residual, ln1_g_ref[l], ln1_b_ref[l])

        # position-wise feed-forward (ReLU).
        residual = x
        h1 = jnp.dot(x.astype(bf16), w1_ref[l],
                     preferred_element_type=f32) + b1_ref[l]
        h1 = jnp.maximum(h1, 0.0)
        y = jnp.dot(h1.astype(bf16), w2_ref[l],
                    preferred_element_type=f32) + b2_ref[l]
        # TODO(synk): FFN dropout — identity in eval mode.
        x = _layer_norm(y + residual, ln2_g_ref[l], ln2_b_ref[l])

    o_ref[...] = x.astype(o_ref.dtype)


# ----------------------------------------------------------------------------
# Wrapper: one pallas_call, parallel grid over the batch dimension
# ----------------------------------------------------------------------------
def action_encoder_forward(input_array, params, cfg):
    B, S, _ = input_array.shape
    D = cfg['d_model']
    H, dk, dv = cfg['n_head'], cfg['d_k'], cfg['d_v']
    L = cfg['n_layers']
    bf16 = jnp.bfloat16

    # cumulative vocab offsets -> indices point into the concatenated table
    n_p, n_s, n_c = (cfg['n_type_problem'], cfg['n_type_skill'],
                     cfg['n_type_correctness'])
    offs = jnp.array([0, n_p, n_p + n_s, n_p + n_s + n_c], dtype=jnp.int32)
    idx = input_array.astype(jnp.int32) + offs[None, None, :]   # (B, S, 4)
    pos = params['pos_table'][:S]                                # (S, E)

    emb = params['emb_table']
    ln_g, ln_b = params['ln_g'], params['ln_b']
    # matmul weights pre-cast to bf16 (f32 accumulation in-kernel);
    # LayerNorm params and biases stay f32.
    wqkv = params['wqkv'].astype(bf16)
    wfc = params['wfc'].astype(bf16)
    ln1_g, ln1_b = params['ln1_g'], params['ln1_b']
    w1 = params['w1'].astype(bf16)
    b1 = params['b1']
    w2 = params['w2'].astype(bf16)
    b2 = params['b2']
    ln2_g, ln2_b = params['ln2_g'], params['ln2_b']

    def full_spec(arr):
        # whole array resident in VMEM; constant index_map -> DMA'd once.
        return pl.BlockSpec(arr.shape, lambda b, n=arr.ndim: (0,) * n)

    kernel = functools.partial(action_encoder_kernel, L, H, dk, dv, S)

    out = pl.pallas_call(
        kernel,
        out_shape=jax.ShapeDtypeStruct((B, S, D), jnp.float32),
        grid=(B,),
        in_specs=[
            pl.BlockSpec((None, S, 4), lambda b: (b, 0, 0)),    # per-batch idx
            full_spec(emb), full_spec(pos),
            full_spec(ln_g), full_spec(ln_b),
            full_spec(wqkv), full_spec(wfc),
            full_spec(ln1_g), full_spec(ln1_b),
            full_spec(w1), full_spec(b1),
            full_spec(w2), full_spec(b2),
            full_spec(ln2_g), full_spec(ln2_b),
        ],
        out_specs=pl.BlockSpec((None, S, D), lambda b: (b, 0, 0)),
        compiler_params=pltpu.CompilerParams(
            dimension_semantics=("parallel",)),
    )(idx, emb, pos, ln_g, ln_b, wqkv, wfc, ln1_g, ln1_b,
      w1, b1, w2, b2, ln2_g, ln2_b)
    return out


# ----------------------------------------------------------------------------
# Parameter construction (deterministic, synthetic). Embedding tables are
# concatenated, per-layer weights stacked on a leading layer axis, and the
# QKV weights fused (with the 1/sqrt(d_k) scale folded into the Q columns).
# ----------------------------------------------------------------------------
def sinusoid_table(n_position, d_hid):
    pos = np.arange(n_position, dtype=np.float64)[:, None]
    i = np.arange(d_hid, dtype=np.float64)[None, :]
    angle = pos / np.power(10000.0, 2.0 * (i // 2) / d_hid)
    table = np.zeros((n_position, d_hid), dtype=np.float64)
    table[:, 0::2] = np.sin(angle[:, 0::2])
    table[:, 1::2] = np.cos(angle[:, 1::2])
    return jnp.asarray(table, dtype=jnp.float32)


def init_params(key, cfg):
    E = cfg['embedding_size']
    D = cfg['d_model']
    H, dk, dv = cfg['n_head'], cfg['d_k'], cfg['d_v']
    Di = cfg['d_inner']
    L = cfg['n_layers']

    def nrm(k, shape, scale=0.02):
        return (scale * jax.random.normal(k, shape)).astype(jnp.float32)

    keys = jax.random.split(key, 10)

    # single concatenated table: [problem ; skill ; correctness ; qno]
    emb_table = jnp.concatenate([
        nrm(keys[0], (cfg['n_type_problem'], E)),
        nrm(keys[1], (cfg['n_type_skill'], E)),
        nrm(keys[2], (cfg['n_type_correctness'], E)),
        nrm(keys[3], (cfg['n_type_qno'], E)),
    ], axis=0)

    # fused per-layer QKV weight; attention scale folded into the Q columns.
    wq = nrm(keys[4], (L, D, H * dk)) * (1.0 / np.sqrt(dk))
    wk = nrm(keys[5], (L, D, H * dk))
    wv = nrm(keys[6], (L, D, H * dv))
    wqkv = jnp.concatenate([wq, wk, wv], axis=-1)     # (L, D, H*(2*dk+dv))

    params = {
        'emb_table': emb_table,
        'pos_table': sinusoid_table(cfg['n_position'], E),
        'ln_g': jnp.ones((1, D), jnp.float32),
        'ln_b': jnp.zeros((1, D), jnp.float32),
        'wqkv': wqkv,
        'wfc': nrm(keys[7], (L, H * dv, D)),
        'ln1_g': jnp.ones((L, 1, D), jnp.float32),
        'ln1_b': jnp.zeros((L, 1, D), jnp.float32),
        'w1': nrm(keys[8], (L, D, Di)),
        'b1': jnp.zeros((L, 1, Di), jnp.float32),
        'w2': nrm(keys[9], (L, Di, D)),
        'b2': jnp.zeros((L, 1, D), jnp.float32),
        'ln2_g': jnp.ones((L, 1, D), jnp.float32),
        'ln2_b': jnp.zeros((L, 1, D), jnp.float32),
    }
    return params


# ----------------------------------------------------------------------------
if __name__ == "__main__":
    cfg = dict(
        n_type_correctness=4, n_type_problem=10, n_type_skill=6, n_type_qno=12,
        embedding_size=32, n_layers=2, n_head=2, d_k=16, d_v=16,
        d_model=32, d_inner=64, n_position=200,
    )
    B, S = 2, 8

    key = jax.random.PRNGKey(0)
    params = init_params(key, cfg)

    kp, ks, kc, kq = jax.random.split(jax.random.fold_in(key, 123), 4)
    input_array = jnp.concatenate([
        jax.random.randint(kp, (B, S, 1), 0, cfg['n_type_problem']),
        jax.random.randint(ks, (B, S, 1), 0, cfg['n_type_skill']),
        jax.random.randint(kc, (B, S, 1), 0, cfg['n_type_correctness']),
        jax.random.randint(kq, (B, S, 1), 0, cfg['n_type_qno']),
    ], axis=-1).astype(jnp.int32)

    fwd = jax.jit(lambda inp: action_encoder_forward(inp, params, cfg))
    out = jax.block_until_ready(fwd(input_array))
    assert out.shape == (B, S, cfg['d_model'])
    assert bool(jnp.all(jnp.isfinite(out)))
    print("KERNEL_OK")
</pallas_src>

<mosaic_0001>
module attributes {stable_mosaic.version = 11 : i64} {
  func.func @action_encoder_kernel(%arg0: i32, %arg1: memref<1x8x4xi32, #tpu.memory_space<vmem>>, %arg2: memref<32x32xf32, #tpu.memory_space<vmem>>, %arg3: memref<8x32xf32, #tpu.memory_space<vmem>>, %arg4: memref<1x32xf32, #tpu.memory_space<vmem>>, %arg5: memref<1x32xf32, #tpu.memory_space<vmem>>, %arg6: memref<2x32x96xbf16, #tpu.memory_space<vmem>>, %arg7: memref<2x32x32xbf16, #tpu.memory_space<vmem>>, %arg8: memref<2x1x32xf32, #tpu.memory_space<vmem>>, %arg9: memref<2x1x32xf32, #tpu.memory_space<vmem>>, %arg10: memref<2x32x64xbf16, #tpu.memory_space<vmem>>, %arg11: memref<2x1x64xf32, #tpu.memory_space<vmem>>, %arg12: memref<2x64x32xbf16, #tpu.memory_space<vmem>>, %arg13: memref<2x1x32xf32, #tpu.memory_space<vmem>>, %arg14: memref<2x1x32xf32, #tpu.memory_space<vmem>>, %arg15: memref<2x1x32xf32, #tpu.memory_space<vmem>>, %arg16: memref<1x8x32xf32, #tpu.memory_space<vmem>>) attributes {dimension_semantics = [#tpu.dimension_semantics<parallel>], iteration_bounds = array<i64: 2>, scalar_prefetch = 0 : i64, scratch_operands = 0 : i64, tpu.core_type = #tpu.core_type<tc>, window_params = [{transform_indices = @transform_0, window_bounds = array<i64: 1, 8, 4>}, {pipeline_mode = #tpu.pipeline_mode<synchronous>, transform_indices = @transform_1, window_bounds = array<i64: 32, 32>}, {pipeline_mode = #tpu.pipeline_mode<synchronous>, transform_indices = @transform_2, window_bounds = array<i64: 8, 32>}, {pipeline_mode = #tpu.pipeline_mode<synchronous>, transform_indices = @transform_3, window_bounds = array<i64: 1, 32>}, {pipeline_mode = #tpu.pipeline_mode<synchronous>, transform_indices = @transform_4, window_bounds = array<i64: 1, 32>}, {pipeline_mode = #tpu.pipeline_mode<synchronous>, transform_indices = @transform_5, window_bounds = array<i64: 2, 32, 96>}, {pipeline_mode = #tpu.pipeline_mode<synchronous>, transform_indices = @transform_6, window_bounds = array<i64: 2, 32, 32>}, {pipeline_mode = #tpu.pipeline_mode<synchronous>, transform_indices = @transform_7, window_bounds = array<i64: 2, 1, 32>}, {pipeline_mode = #tpu.pipeline_mode<synchronous>, transform_indices = @transform_8, window_bounds = array<i64: 2, 1, 32>}, {pipeline_mode = #tpu.pipeline_mode<synchronous>, transform_indices = @transform_9, window_bounds = array<i64: 2, 32, 64>}, {pipeline_mode = #tpu.pipeline_mode<synchronous>, transform_indices = @transform_10, window_bounds = array<i64: 2, 1, 64>}, {pipeline_mode = #tpu.pipeline_mode<synchronous>, transform_indices = @transform_11, window_bounds = array<i64: 2, 64, 32>}, {pipeline_mode = #tpu.pipeline_mode<synchronous>, transform_indices = @transform_12, window_bounds = array<i64: 2, 1, 32>}, {pipeline_mode = #tpu.pipeline_mode<synchronous>, transform_indices = @transform_13, window_bounds = array<i64: 2, 1, 32>}, {pipeline_mode = #tpu.pipeline_mode<synchronous>, transform_indices = @transform_14, window_bounds = array<i64: 2, 1, 32>}, {transform_indices = @transform_15, window_bounds = array<i64: 1, 8, 32>}]} {
    %0 = tpu.iota {dimensions = array<i32: 1>} : vector<8x32xi32>
    %cst = arith.constant 0.000000e+00 : f32
    %1 = vector.broadcast %cst : f32 to vector<8x32xf32>
    %c0 = arith.constant 0 : index
    %c0_0 = arith.constant 0 : index
    %c0_1 = arith.constant 0 : index
    %2 = vector.load %arg1[%c0, %c0_0, %c0_1] : memref<1x8x4xi32, #tpu.memory_space<vmem>>, vector<1x8x1xi32>
    %3 = vector.shape_cast %2 : vector<1x8x1xi32> to vector<8x1xi32>
    %4 = vector.broadcast %3 : vector<8x1xi32> to vector<8x32xi32>
    %5 = arith.cmpi eq, %4, %0 : vector<8x32xi32>
    %6 = arith.extui %5 : vector<8x32xi1> to vector<8x32xi32>
    %7 = arith.sitofp %6 : vector<8x32xi32> to vector<8x32xf32>
    %8 = arith.addf %1, %7 : vector<8x32xf32>
    %c0_2 = arith.constant 0 : index
    %c0_3 = arith.constant 0 : index
    %c1 = arith.constant 1 : index
    %9 = vector.load %arg1[%c0_2, %c0_3, %c1] : memref<1x8x4xi32, #tpu.memory_space<vmem>>, vector<1x8x1xi32>
    %10 = vector.shape_cast %9 : vector<1x8x1xi32> to vector<8x1xi32>
    %11 = vector.broadcast %10 : vector<8x1xi32> to vector<8x32xi32>
    %12 = arith.cmpi eq, %11, %0 : vector<8x32xi32>
    %13 = arith.extui %12 : vector<8x32xi1> to vector<8x32xi32>
    %14 = arith.sitofp %13 : vector<8x32xi32> to vector<8x32xf32>
    %15 = arith.addf %8, %14 : vector<8x32xf32>
    %c0_4 = arith.constant 0 : index
    %c0_5 = arith.constant 0 : index
    %c2 = arith.constant 2 : index
    %16 = vector.load %arg1[%c0_4, %c0_5, %c2] : memref<1x8x4xi32, #tpu.memory_space<vmem>>, vector<1x8x1xi32>
    %17 = vector.shape_cast %16 : vector<1x8x1xi32> to vector<8x1xi32>
    %18 = vector.broadcast %17 : vector<8x1xi32> to vector<8x32xi32>
    %19 = arith.cmpi eq, %18, %0 : vector<8x32xi32>
    %20 = arith.extui %19 : vector<8x32xi1> to vector<8x32xi32>
    %21 = arith.sitofp %20 : vector<8x32xi32> to vector<8x32xf32>
    %22 = arith.addf %15, %21 : vector<8x32xf32>
    %c0_6 = arith.constant 0 : index
    %c0_7 = arith.constant 0 : index
    %c3 = arith.constant 3 : index
    %23 = vector.load %arg1[%c0_6, %c0_7, %c3] : memref<1x8x4xi32, #tpu.memory_space<vmem>>, vector<1x8x1xi32>
    %24 = vector.shape_cast %23 : vector<1x8x1xi32> to vector<8x1xi32>
    %25 = vector.broadcast %24 : vector<8x1xi32> to vector<8x32xi32>
    %26 = arith.cmpi eq, %25, %0 : vector<8x32xi32>
    %27 = arith.extui %26 : vector<8x32xi1> to vector<8x32xi32>
    %28 = arith.sitofp %27 : vector<8x32xi32> to vector<8x32xf32>
    %29 = arith.addf %22, %28 : vector<8x32xf32>
    %c0_8 = arith.constant 0 : index
    %c0_9 = arith.constant 0 : index
    %30 = vector.load %arg2[%c0_8, %c0_9] : memref<32x32xf32, #tpu.memory_space<vmem>>, vector<32x32xf32>
    %cst_10 = arith.constant dense<0.000000e+00> : vector<8x32xf32>
    %31 = tpu.matmul %29, %30, %cst_10 {dimension_numbers = #tpu.dot_dimension_numbers<[1], [0], [0], [1], [0, 0, 1, 1], [], []>, precision = #tpu.contract_precision<fp32>} : vector<8x32xf32>, vector<32x32xf32>, vector<8x32xf32> -> vector<8x32xf32>
    %c0_11 = arith.constant 0 : index
    %c0_12 = arith.constant 0 : index
    %32 = vector.load %arg3[%c0_11, %c0_12] : memref<8x32xf32, #tpu.memory_space<vmem>>, vector<8x32xf32>
    %33 = arith.addf %31, %32 : vector<8x32xf32>
    %c0_13 = arith.constant 0 : index
    %c0_14 = arith.constant 0 : index
    %34 = vector.load %arg4[%c0_13, %c0_14] : memref<1x32xf32, #tpu.memory_space<vmem>>, vector<1x32xf32>
    %c0_15 = arith.constant 0 : index
    %c0_16 = arith.constant 0 : index
    %35 = vector.load %arg5[%c0_15, %c0_16] : memref<1x32xf32, #tpu.memory_space<vmem>>, vector<1x32xf32>
    %cst_17 = arith.constant dense<0.000000e+00> : vector<8xf32>
    %36 = vector.multi_reduction <add>, %33, %cst_17 [1] : vector<8x32xf32> to vector<8xf32>
    %37 = vector.shape_cast %36 : vector<8xf32> to vector<8x1xf32>
    %cst_18 = arith.constant 3.125000e-02 : f32
    %38 = vector.broadcast %cst_18 : f32 to vector<8x1xf32>
    %39 = arith.mulf %37, %38 : vector<8x1xf32>
    %40 = arith.mulf %33, %33 : vector<8x32xf32>
    %cst_19 = arith.constant dense<0.000000e+00> : vector<8xf32>
    %41 = vector.multi_reduction <add>, %40, %cst_19 [1] : vector<8x32xf32> to vector<8xf32>
    %42 = vector.shape_cast %41 : vector<8xf32> to vector<8x1xf32>
    %cst_20 = arith.constant 3.125000e-02 : f32
    %43 = vector.broadcast %cst_20 : f32 to vector<8x1xf32>
    %44 = arith.mulf %42, %43 : vector<8x1xf32>
    %45 = arith.mulf %39, %39 : vector<8x1xf32>
    %46 = arith.subf %44, %45 : vector<8x1xf32>
    %cst_21 = arith.constant 0.000000e+00 : f32
    %47 = vector.broadcast %cst_21 : f32 to vector<8x1xf32>
    %48 = arith.maximumf %46, %47 : vector<8x1xf32>
    %49 = vector.broadcast %39 : vector<8x1xf32> to vector<8x32xf32>
    %50 = arith.subf %33, %49 : vector<8x32xf32>
    %cst_22 = arith.constant 9.99999997E-7 : f32
    %51 = vector.broadcast %cst_22 : f32 to vector<8x1xf32>
    %52 = arith.addf %48, %51 : vector<8x1xf32>
    %53 = math.rsqrt %52 : vector<8x1xf32>
    %54 = vector.broadcast %53 : vector<8x1xf32> to vector<8x32xf32>
    %55 = arith.mulf %50, %54 : vector<8x32xf32>
    %56 = vector.broadcast %34 : vector<1x32xf32> to vector<8x32xf32>
    %57 = arith.mulf %55, %56 : vector<8x32xf32>
    %58 = vector.broadcast %35 : vector<1x32xf32> to vector<8x32xf32>
    %59 = arith.addf %57, %58 : vector<8x32xf32>
    %60 = arith.truncf %59 : vector<8x32xf32> to vector<8x32xbf16>
    %c0_23 = arith.constant 0 : index
    %c0_24 = arith.constant 0 : index
    %c0_25 = arith.constant 0 : index
    %61 = vector.load %arg6[%c0_23, %c0_24, %c0_25] : memref<2x32x96xbf16, #tpu.memory_space<vmem>>, vector<1x32x96xbf16>
    %62 = vector.shape_cast %61 : vector<1x32x96xbf16> to vector<32x96xbf16>
    %cst_26 = arith.constant dense<0.000000e+00> : vector<8x96xf32>
    %63 = tpu.matmul %60, %62, %cst_26 {dimension_numbers = #tpu.dot_dimension_numbers<[1], [0], [0], [1], [0, 0, 1, 1], [], []>} : vector<8x32xbf16>, vector<32x96xbf16>, vector<8x96xf32> -> vector<8x96xf32>
    %64 = arith.truncf %63 : vector<8x96xf32> to vector<8x96xbf16>
    %65 = vector.extract_strided_slice %64 {offsets = [0, 0], sizes = [8, 16], strides = [1, 1]} : vector<8x96xbf16> to vector<8x16xbf16>
    %66 = vector.shape_cast %65 : vector<8x16xbf16> to vector<1x8x16xbf16>
    %67 = vector.extract_strided_slice %64 {offsets = [0, 16], sizes = [8, 16], strides = [1, 1]} : vector<8x96xbf16> to vector<8x16xbf16>
    %68 = vector.shape_cast %67 : vector<8x16xbf16> to vector<1x8x16xbf16>
    %69 = tpu.concatenate %66, %68 in 0 : vector<1x8x16xbf16>, vector<1x8x16xbf16> -> vector<2x8x16xbf16>
    %70 = vector.extract_strided_slice %64 {offsets = [0, 32], sizes = [8, 16], strides = [1, 1]} : vector<8x96xbf16> to vector<8x16xbf16>
    %71 = vector.shape_cast %70 : vector<8x16xbf16> to vector<1x8x16xbf16>
    %72 = vector.extract_strided_slice %64 {offsets = [0, 48], sizes = [8, 16], strides = [1, 1]} : vector<8x96xbf16> to vector<8x16xbf16>
    %73 = vector.shape_cast %72 : vector<8x16xbf16> to vector<1x8x16xbf16>
    %74 = tpu.concatenate %71, %73 in 0 : vector<1x8x16xbf16>, vector<1x8x16xbf16> -> vector<2x8x16xbf16>
    %75 = vector.extract_strided_slice %64 {offsets = [0, 64], sizes = [8, 16], strides = [1, 1]} : vector<8x96xbf16> to vector<8x16xbf16>
    %76 = vector.shape_cast %75 : vector<8x16xbf16> to vector<1x8x16xbf16>
    %77 = vector.extract_strided_slice %64 {offsets = [0, 80], sizes = [8, 16], strides = [1, 1]} : vector<8x96xbf16> to vector<8x16xbf16>
    %78 = vector.shape_cast %77 : vector<8x16xbf16> to vector<1x8x16xbf16>
    %79 = tpu.concatenate %76, %78 in 0 : vector<1x8x16xbf16>, vector<1x8x16xbf16> -> vector<2x8x16xbf16>
    "tpu.trace_start"() <{level = 10 : i32, message = "hqd,hkd->hqk"}> : () -> ()
    %cst_27 = arith.constant dense<0.000000e+00> : vector<2x8x8xf32>
    %80 = tpu.matmul %69, %74, %cst_27 {dimension_numbers = #tpu.dot_dimension_numbers<[2], [2], [1], [1], [0, 0, 0, 1, 1, 1], [0], [0]>} : vector<2x8x16xbf16>, vector<2x8x16xbf16>, vector<2x8x8xf32> -> vector<2x8x8xf32>
    "tpu.trace_stop"() : () -> ()
    %cst_28 = arith.constant dense<0xFF800000> : vector<2x8xf32>
    %81 = vector.multi_reduction <maximumf>, %80, %cst_28 [2] : vector<2x8x8xf32> to vector<2x8xf32>
    %82 = vector.shape_cast %81 : vector<2x8xf32> to vector<2x8x1xf32>
    %83 = vector.broadcast %82 : vector<2x8x1xf32> to vector<2x8x8xf32>
    %84 = arith.subf %80, %83 : vector<2x8x8xf32>
    %85 = math.exp %84 : vector<2x8x8xf32>
    %cst_29 = arith.constant dense<0.000000e+00> : vector<2x8xf32>
    %86 = vector.multi_reduction <add>, %85, %cst_29 [2] : vector<2x8x8xf32> to vector<2x8xf32>
    %87 = vector.shape_cast %86 : vector<2x8xf32> to vector<2x8x1xf32>
    %88 = tpu.reciprocal %87 {approx = true} : vector<2x8x1xf32> -> vector<2x8x1xf32>
    %89 = vector.broadcast %88 : vector<2x8x1xf32> to vector<2x8x8xf32>
    %90 = arith.mulf %85, %89 : vector<2x8x8xf32>
    %91 = arith.truncf %90 : vector<2x8x8xf32> to vector<2x8x8xbf16>
    "tpu.trace_start"() <{level = 10 : i32, message = "hqk,hkd->hqd"}> : () -> ()
    %cst_30 = arith.constant dense<0.000000e+00> : vector<2x8x16xf32>
    %92 = tpu.matmul %91, %79, %cst_30 {dimension_numbers = #tpu.dot_dimension_numbers<[2], [1], [1], [2], [0, 0, 0, 1, 1, 2], [0], [0]>} : vector<2x8x8xbf16>, vector<2x8x16xbf16>, vector<2x8x16xf32> -> vector<2x8x16xf32>
    "tpu.trace_stop"() : () -> ()
    %93 = vector.extract_strided_slice %92 {offsets = [0, 0, 0], sizes = [1, 8, 16], strides = [1, 1, 1]} : vector<2x8x16xf32> to vector<1x8x16xf32>
    %94 = vector.shape_cast %93 : vector<1x8x16xf32> to vector<8x16xf32>
    %95 = vector.extract_strided_slice %92 {offsets = [1, 0, 0], sizes = [1, 8, 16], strides = [1, 1, 1]} : vector<2x8x16xf32> to vector<1x8x16xf32>
    %96 = vector.shape_cast %95 : vector<1x8x16xf32> to vector<8x16xf32>
    %97 = tpu.concatenate %94, %96 in 1 : vector<8x16xf32>, vector<8x16xf32> -> vector<8x32xf32>
    %98 = arith.truncf %97 : vector<8x32xf32> to vector<8x32xbf16>
    %c0_31 = arith.constant 0 : index
    %c0_32 = arith.constant 0 : index
    %c0_33 = arith.constant 0 : index
    %99 = vector.load %arg7[%c0_31, %c0_32, %c0_33] : memref<2x32x32xbf16, #tpu.memory_space<vmem>>, vector<1x32x32xbf16>
    %100 = vector.shape_cast %99 : vector<1x32x32xbf16> to vector<32x32xbf16>
    %cst_34 = arith.constant dense<0.000000e+00> : vector<8x32xf32>
    %101 = tpu.matmul %98, %100, %cst_34 {dimension_numbers = #tpu.dot_dimension_numbers<[1], [0], [0], [1], [0, 0, 1, 1], [], []>} : vector<8x32xbf16>, vector<32x32xbf16>, vector<8x32xf32> -> vector<8x32xf32>
    %102 = arith.addf %101, %59 : vector<8x32xf32>
    %c0_35 = arith.constant 0 : index
    %c0_36 = arith.constant 0 : index
    %c0_37 = arith.constant 0 : index
    %103 = vector.load %arg8[%c0_35, %c0_36, %c0_37] : memref<2x1x32xf32, #tpu.memory_space<vmem>>, vector<1x1x32xf32>
    %104 = vector.shape_cast %103 : vector<1x1x32xf32> to vector<1x32xf32>
    %c0_38 = arith.constant 0 : index
    %c0_39 = arith.constant 0 : index
    %c0_40 = arith.constant 0 : index
    %105 = vector.load %arg9[%c0_38, %c0_39, %c0_40] : memref<2x1x32xf32, #tpu.memory_space<vmem>>, vector<1x1x32xf32>
    %106 = vector.shape_cast %105 : vector<1x1x32xf32> to vector<1x32xf32>
    %cst_41 = arith.constant dense<0.000000e+00> : vector<8xf32>
    %107 = vector.multi_reduction <add>, %102, %cst_41 [1] : vector<8x32xf32> to vector<8xf32>
    %108 = vector.shape_cast %107 : vector<8xf32> to vector<8x1xf32>
    %cst_42 = arith.constant 3.125000e-02 : f32
    %109 = vector.broadcast %cst_42 : f32 to vector<8x1xf32>
    %110 = arith.mulf %108, %109 : vector<8x1xf32>
    %111 = arith.mulf %102, %102 : vector<8x32xf32>
    %cst_43 = arith.constant dense<0.000000e+00> : vector<8xf32>
    %112 = vector.multi_reduction <add>, %111, %cst_43 [1] : vector<8x32xf32> to vector<8xf32>
    %113 = vector.shape_cast %112 : vector<8xf32> to vector<8x1xf32>
    %cst_44 = arith.constant 3.125000e-02 : f32
    %114 = vector.broadcast %cst_44 : f32 to vector<8x1xf32>
    %115 = arith.mulf %113, %114 : vector<8x1xf32>
    %116 = arith.mulf %110, %110 : vector<8x1xf32>
    %117 = arith.subf %115, %116 : vector<8x1xf32>
    %cst_45 = arith.constant 0.000000e+00 : f32
    %118 = vector.broadcast %cst_45 : f32 to vector<8x1xf32>
    %119 = arith.maximumf %117, %118 : vector<8x1xf32>
    %120 = vector.broadcast %110 : vector<8x1xf32> to vector<8x32xf32>
    %121 = arith.subf %102, %120 : vector<8x32xf32>
    %cst_46 = arith.constant 9.99999997E-7 : f32
    %122 = vector.broadcast %cst_46 : f32 to vector<8x1xf32>
    %123 = arith.addf %119, %122 : vector<8x1xf32>
    %124 = math.rsqrt %123 : vector<8x1xf32>
    %125 = vector.broadcast %124 : vector<8x1xf32> to vector<8x32xf32>
    %126 = arith.mulf %121, %125 : vector<8x32xf32>
    %127 = vector.broadcast %104 : vector<1x32xf32> to vector<8x32xf32>
    %128 = arith.mulf %126, %127 : vector<8x32xf32>
    %129 = vector.broadcast %106 : vector<1x32xf32> to vector<8x32xf32>
    %130 = arith.addf %128, %129 : vector<8x32xf32>
    %131 = arith.truncf %130 : vector<8x32xf32> to vector<8x32xbf16>
    %c0_47 = arith.constant 0 : index
    %c0_48 = arith.constant 0 : index
    %c0_49 = arith.constant 0 : index
    %132 = vector.load %arg10[%c0_47, %c0_48, %c0_49] : memref<2x32x64xbf16, #tpu.memory_space<vmem>>, vector<1x32x64xbf16>
    %133 = vector.shape_cast %132 : vector<1x32x64xbf16> to vector<32x64xbf16>
    %cst_50 = arith.constant dense<0.000000e+00> : vector<8x64xf32>
    %134 = tpu.matmul %131, %133, %cst_50 {dimension_numbers = #tpu.dot_dimension_numbers<[1], [0], [0], [1], [0, 0, 1, 1], [], []>} : vector<8x32xbf16>, vector<32x64xbf16>, vector<8x64xf32> -> vector<8x64xf32>
    %c0_51 = arith.constant 0 : index
    %c0_52 = arith.constant 0 : index
    %c0_53 = arith.constant 0 : index
    %135 = vector.load %arg11[%c0_51, %c0_52, %c0_53] : memref<2x1x64xf32, #tpu.memory_space<vmem>>, vector<1x1x64xf32>
    %136 = vector.shape_cast %135 : vector<1x1x64xf32> to vector<1x64xf32>
    %137 = vector.broadcast %136 : vector<1x64xf32> to vector<8x64xf32>
    %138 = arith.addf %134, %137 : vector<8x64xf32>
    %cst_54 = arith.constant 0.000000e+00 : f32
    %139 = vector.broadcast %cst_54 : f32 to vector<8x64xf32>
    %140 = arith.maximumf %138, %139 : vector<8x64xf32>
    %141 = arith.truncf %140 : vector<8x64xf32> to vector<8x64xbf16>
    %c0_55 = arith.constant 0 : index
    %c0_56 = arith.constant 0 : index
    %c0_57 = arith.constant 0 : index
    %142 = vector.load %arg12[%c0_55, %c0_56, %c0_57] : memref<2x64x32xbf16, #tpu.memory_space<vmem>>, vector<1x64x32xbf16>
    %143 = vector.shape_cast %142 : vector<1x64x32xbf16> to vector<64x32xbf16>
    %cst_58 = arith.constant dense<0.000000e+00> : vector<8x32xf32>
    %144 = tpu.matmul %141, %143, %cst_58 {dimension_numbers = #tpu.dot_dimension_numbers<[1], [0], [0], [1], [0, 0, 1, 1], [], []>} : vector<8x64xbf16>, vector<64x32xbf16>, vector<8x32xf32> -> vector<8x32xf32>
    %c0_59 = arith.constant 0 : index
    %c0_60 = arith.constant 0 : index
    %c0_61 = arith.constant 0 : index
    %145 = vector.load %arg13[%c0_59, %c0_60, %c0_61] : memref<2x1x32xf32, #tpu.memory_space<vmem>>, vector<1x1x32xf32>
    %146 = vector.shape_cast %145 : vector<1x1x32xf32> to vector<1x32xf32>
    %147 = vector.broadcast %146 : vector<1x32xf32> to vector<8x32xf32>
    %148 = arith.addf %144, %147 : vector<8x32xf32>
    %149 = arith.addf %148, %130 : vector<8x32xf32>
    %c0_62 = arith.constant 0 : index
    %c0_63 = arith.constant 0 : index
    %c0_64 = arith.constant 0 : index
    %150 = vector.load %arg14[%c0_62, %c0_63, %c0_64] : memref<2x1x32xf32, #tpu.memory_space<vmem>>, vector<1x1x32xf32>
    %151 = vector.shape_cast %150 : vector<1x1x32xf32> to vector<1x32xf32>
    %c0_65 = arith.constant 0 : index
    %c0_66 = arith.constant 0 : index
    %c0_67 = arith.constant 0 : index
    %152 = vector.load %arg15[%c0_65, %c0_66, %c0_67] : memref<2x1x32xf32, #tpu.memory_space<vmem>>, vector<1x1x32xf32>
    %153 = vector.shape_cast %152 : vector<1x1x32xf32> to vector<1x32xf32>
    %cst_68 = arith.constant dense<0.000000e+00> : vector<8xf32>
    %154 = vector.multi_reduction <add>, %149, %cst_68 [1] : vector<8x32xf32> to vector<8xf32>
    %155 = vector.shape_cast %154 : vector<8xf32> to vector<8x1xf32>
    %cst_69 = arith.constant 3.125000e-02 : f32
    %156 = vector.broadcast %cst_69 : f32 to vector<8x1xf32>
    %157 = arith.mulf %155, %156 : vector<8x1xf32>
    %158 = arith.mulf %149, %149 : vector<8x32xf32>
    %cst_70 = arith.constant dense<0.000000e+00> : vector<8xf32>
    %159 = vector.multi_reduction <add>, %158, %cst_70 [1] : vector<8x32xf32> to vector<8xf32>
    %160 = vector.shape_cast %159 : vector<8xf32> to vector<8x1xf32>
    %cst_71 = arith.constant 3.125000e-02 : f32
    %161 = vector.broadcast %cst_71 : f32 to vector<8x1xf32>
    %162 = arith.mulf %160, %161 : vector<8x1xf32>
    %163 = arith.mulf %157, %157 : vector<8x1xf32>
    %164 = arith.subf %162, %163 : vector<8x1xf32>
    %cst_72 = arith.constant 0.000000e+00 : f32
    %165 = vector.broadcast %cst_72 : f32 to vector<8x1xf32>
    %166 = arith.maximumf %164, %165 : vector<8x1xf32>
    %167 = vector.broadcast %157 : vector<8x1xf32> to vector<8x32xf32>
    %168 = arith.subf %149, %167 : vector<8x32xf32>
    %cst_73 = arith.constant 9.99999997E-7 : f32
    %169 = vector.broadcast %cst_73 : f32 to vector<8x1xf32>
    %170 = arith.addf %166, %169 : vector<8x1xf32>
    %171 = math.rsqrt %170 : vector<8x1xf32>
    %172 = vector.broadcast %171 : vector<8x1xf32> to vector<8x32xf32>
    %173 = arith.mulf %168, %172 : vector<8x32xf32>
    %174 = vector.broadcast %151 : vector<1x32xf32> to vector<8x32xf32>
    %175 = arith.mulf %173, %174 : vector<8x32xf32>
    %176 = vector.broadcast %153 : vector<1x32xf32> to vector<8x32xf32>
    %177 = arith.addf %175, %176 : vector<8x32xf32>
    %178 = arith.truncf %177 : vector<8x32xf32> to vector<8x32xbf16>
    %c1_74 = arith.constant 1 : index
    %c0_75 = arith.constant 0 : index
    %c0_76 = arith.constant 0 : index
    %179 = vector.load %arg6[%c1_74, %c0_75, %c0_76] : memref<2x32x96xbf16, #tpu.memory_space<vmem>>, vector<1x32x96xbf16>
    %180 = vector.shape_cast %179 : vector<1x32x96xbf16> to vector<32x96xbf16>
    %cst_77 = arith.constant dense<0.000000e+00> : vector<8x96xf32>
    %181 = tpu.matmul %178, %180, %cst_77 {dimension_numbers = #tpu.dot_dimension_numbers<[1], [0], [0], [1], [0, 0, 1, 1], [], []>} : vector<8x32xbf16>, vector<32x96xbf16>, vector<8x96xf32> -> vector<8x96xf32>
    %182 = arith.truncf %181 : vector<8x96xf32> to vector<8x96xbf16>
    %183 = vector.extract_strided_slice %182 {offsets = [0, 0], sizes = [8, 16], strides = [1, 1]} : vector<8x96xbf16> to vector<8x16xbf16>
    %184 = vector.shape_cast %183 : vector<8x16xbf16> to vector<1x8x16xbf16>
    %185 = vector.extract_strided_slice %182 {offsets = [0, 16], sizes = [8, 16], strides = [1, 1]} : vector<8x96xbf16> to vector<8x16xbf16>
    %186 = vector.shape_cast %185 : vector<8x16xbf16> to vector<1x8x16xbf16>
    %187 = tpu.concatenate %184, %186 in 0 : vector<1x8x16xbf16>, vector<1x8x16xbf16> -> vector<2x8x16xbf16>
    %188 = vector.extract_strided_slice %182 {offsets = [0, 32], sizes = [8, 16], strides = [1, 1]} : vector<8x96xbf16> to vector<8x16xbf16>
    %189 = vector.shape_cast %188 : vector<8x16xbf16> to vector<1x8x16xbf16>
    %190 = vector.extract_strided_slice %182 {offsets = [0, 48], sizes = [8, 16], strides = [1, 1]} : vector<8x96xbf16> to vector<8x16xbf16>
    %191 = vector.shape_cast %190 : vector<8x16xbf16> to vector<1x8x16xbf16>
    %192 = tpu.concatenate %189, %191 in 0 : vector<1x8x16xbf16>, vector<1x8x16xbf16> -> vector<2x8x16xbf16>
    %193 = vector.extract_strided_slice %182 {offsets = [0, 64], sizes = [8, 16], strides = [1, 1]} : vector<8x96xbf16> to vector<8x16xbf16>
    %194 = vector.shape_cast %193 : vector<8x16xbf16> to vector<1x8x16xbf16>
    %195 = vector.extract_strided_slice %182 {offsets = [0, 80], sizes = [8, 16], strides = [1, 1]} : vector<8x96xbf16> to vector<8x16xbf16>
    %196 = vector.shape_cast %195 : vector<8x16xbf16> to vector<1x8x16xbf16>
    %197 = tpu.concatenate %194, %196 in 0 : vector<1x8x16xbf16>, vector<1x8x16xbf16> -> vector<2x8x16xbf16>
    "tpu.trace_start"() <{level = 10 : i32, message = "hqd,hkd->hqk"}> : () -> ()
    %cst_78 = arith.constant dense<0.000000e+00> : vector<2x8x8xf32>
    %198 = tpu.matmul %187, %192, %cst_78 {dimension_numbers = #tpu.dot_dimension_numbers<[2], [2], [1], [1], [0, 0, 0, 1, 1, 1], [0], [0]>} : vector<2x8x16xbf16>, vector<2x8x16xbf16>, vector<2x8x8xf32> -> vector<2x8x8xf32>
    "tpu.trace_stop"() : () -> ()
    %cst_79 = arith.constant dense<0xFF800000> : vector<2x8xf32>
    %199 = vector.multi_reduction <maximumf>, %198, %cst_79 [2] : vector<2x8x8xf32> to vector<2x8xf32>
    %200 = vector.shape_cast %199 : vector<2x8xf32> to vector<2x8x1xf32>
    %201 = vector.broadcast %200 : vector<2x8x1xf32> to vector<2x8x8xf32>
    %202 = arith.subf %198, %201 : vector<2x8x8xf32>
    %203 = math.exp %202 : vector<2x8x8xf32>
    %cst_80 = arith.constant dense<0.000000e+00> : vector<2x8xf32>
    %204 = vector.multi_reduction <add>, %203, %cst_80 [2] : vector<2x8x8xf32> to vector<2x8xf32>
    %205 = vector.shape_cast %204 : vector<2x8xf32> to vector<2x8x1xf32>
    %206 = tpu.reciprocal %205 {approx = true} : vector<2x8x1xf32> -> vector<2x8x1xf32>
    %207 = vector.broadcast %206 : vector<2x8x1xf32> to vector<2x8x8xf32>
    %208 = arith.mulf %203, %207 : vector<2x8x8xf32>
    %209 = arith.truncf %208 : vector<2x8x8xf32> to vector<2x8x8xbf16>
    "tpu.trace_start"() <{level = 10 : i32, message = "hqk,hkd->hqd"}> : () -> ()
    %cst_81 = arith.constant dense<0.000000e+00> : vector<2x8x16xf32>
    %210 = tpu.matmul %209, %197, %cst_81 {dimension_numbers = #tpu.dot_dimension_numbers<[2], [1], [1], [2], [0, 0, 0, 1, 1, 2], [0], [0]>} : vector<2x8x8xbf16>, vector<2x8x16xbf16>, vector<2x8x16xf32> -> vector<2x8x16xf32>
    "tpu.trace_stop"() : () -> ()
    %211 = vector.extract_strided_slice %210 {offsets = [0, 0, 0], sizes = [1, 8, 16], strides = [1, 1, 1]} : vector<2x8x16xf32> to vector<1x8x16xf32>
    %212 = vector.shape_cast %211 : vector<1x8x16xf32> to vector<8x16xf32>
    %213 = vector.extract_strided_slice %210 {offsets = [1, 0, 0], sizes = [1, 8, 16], strides = [1, 1, 1]} : vector<2x8x16xf32> to vector<1x8x16xf32>
    %214 = vector.shape_cast %213 : vector<1x8x16xf32> to vector<8x16xf32>
    %215 = tpu.concatenate %212, %214 in 1 : vector<8x16xf32>, vector<8x16xf32> -> vector<8x32xf32>
    %216 = arith.truncf %215 : vector<8x32xf32> to vector<8x32xbf16>
    %c1_82 = arith.constant 1 : index
    %c0_83 = arith.constant 0 : index
    %c0_84 = arith.constant 0 : index
    %217 = vector.load %arg7[%c1_82, %c0_83, %c0_84] : memref<2x32x32xbf16, #tpu.memory_space<vmem>>, vector<1x32x32xbf16>
    %218 = vector.shape_cast %217 : vector<1x32x32xbf16> to vector<32x32xbf16>
    %cst_85 = arith.constant dense<0.000000e+00> : vector<8x32xf32>
    %219 = tpu.matmul %216, %218, %cst_85 {dimension_numbers = #tpu.dot_dimension_numbers<[1], [0], [0], [1], [0, 0, 1, 1], [], []>} : vector<8x32xbf16>, vector<32x32xbf16>, vector<8x32xf32> -> vector<8x32xf32>
    %220 = arith.addf %219, %177 : vector<8x32xf32>
    %c1_86 = arith.constant 1 : index
    %c0_87 = arith.constant 0 : index
    %c0_88 = arith.constant 0 : index
    %221 = vector.load %arg8[%c1_86, %c0_87, %c0_88] : memref<2x1x32xf32, #tpu.memory_space<vmem>>, vector<1x1x32xf32>
    %222 = vector.shape_cast %221 : vector<1x1x32xf32> to vector<1x32xf32>
    %c1_89 = arith.constant 1 : index
    %c0_90 = arith.constant 0 : index
    %c0_91 = arith.constant 0 : index
    %223 = vector.load %arg9[%c1_89, %c0_90, %c0_91] : memref<2x1x32xf32, #tpu.memory_space<vmem>>, vector<1x1x32xf32>
    %224 = vector.shape_cast %223 : vector<1x1x32xf32> to vector<1x32xf32>
    %cst_92 = arith.constant dense<0.000000e+00> : vector<8xf32>
    %225 = vector.multi_reduction <add>, %220, %cst_92 [1] : vector<8x32xf32> to vector<8xf32>
    %226 = vector.shape_cast %225 : vector<8xf32> to vector<8x1xf32>
    %cst_93 = arith.constant 3.125000e-02 : f32
    %227 = vector.broadcast %cst_93 : f32 to vector<8x1xf32>
    %228 = arith.mulf %226, %227 : vector<8x1xf32>
    %229 = arith.mulf %220, %220 : vector<8x32xf32>
    %cst_94 = arith.constant dense<0.000000e+00> : vector<8xf32>
    %230 = vector.multi_reduction <add>, %229, %cst_94 [1] : vector<8x32xf32> to vector<8xf32>
    %231 = vector.shape_cast %230 : vector<8xf32> to vector<8x1xf32>
    %cst_95 = arith.constant 3.125000e-02 : f32
    %232 = vector.broadcast %cst_95 : f32 to vector<8x1xf32>
    %233 = arith.mulf %231, %232 : vector<8x1xf32>
    %234 = arith.mulf %228, %228 : vector<8x1xf32>
    %235 = arith.subf %233, %234 : vector<8x1xf32>
    %cst_96 = arith.constant 0.000000e+00 : f32
    %236 = vector.broadcast %cst_96 : f32 to vector<8x1xf32>
    %237 = arith.maximumf %235, %236 : vector<8x1xf32>
    %238 = vector.broadcast %228 : vector<8x1xf32> to vector<8x32xf32>
    %239 = arith.subf %220, %238 : vector<8x32xf32>
    %cst_97 = arith.constant 9.99999997E-7 : f32
    %240 = vector.broadcast %cst_97 : f32 to vector<8x1xf32>
    %241 = arith.addf %237, %240 : vector<8x1xf32>
    %242 = math.rsqrt %241 : vector<8x1xf32>
    %243 = vector.broadcast %242 : vector<8x1xf32> to vector<8x32xf32>
    %244 = arith.mulf %239, %243 : vector<8x32xf32>
    %245 = vector.broadcast %222 : vector<1x32xf32> to vector<8x32xf32>
    %246 = arith.mulf %244, %245 : vector<8x32xf32>
    %247 = vector.broadcast %224 : vector<1x32xf32> to vector<8x32xf32>
    %248 = arith.addf %246, %247 : vector<8x32xf32>
    %249 = arith.truncf %248 : vector<8x32xf32> to vector<8x32xbf16>
    %c1_98 = arith.constant 1 : index
    %c0_99 = arith.constant 0 : index
    %c0_100 = arith.constant 0 : index
    %250 = vector.load %arg10[%c1_98, %c0_99, %c0_100] : memref<2x32x64xbf16, #tpu.memory_space<vmem>>, vector<1x32x64xbf16>
    %251 = vector.shape_cast %250 : vector<1x32x64xbf16> to vector<32x64xbf16>
    %cst_101 = arith.constant dense<0.000000e+00> : vector<8x64xf32>
    %252 = tpu.matmul %249, %251, %cst_101 {dimension_numbers = #tpu.dot_dimension_numbers<[1], [0], [0], [1], [0, 0, 1, 1], [], []>} : vector<8x32xbf16>, vector<32x64xbf16>, vector<8x64xf32> -> vector<8x64xf32>
    %c1_102 = arith.constant 1 : index
    %c0_103 = arith.constant 0 : index
    %c0_104 = arith.constant 0 : index
    %253 = vector.load %arg11[%c1_102, %c0_103, %c0_104] : memref<2x1x64xf32, #tpu.memory_space<vmem>>, vector<1x1x64xf32>
    %254 = vector.shape_cast %253 : vector<1x1x64xf32> to vector<1x64xf32>
    %255 = vector.broadcast %254 : vector<1x64xf32> to vector<8x64xf32>
    %256 = arith.addf %252, %255 : vector<8x64xf32>
    %cst_105 = arith.constant 0.000000e+00 : f32
    %257 = vector.broadcast %cst_105 : f32 to vector<8x64xf32>
    %258 = arith.maximumf %256, %257 : vector<8x64xf32>
    %259 = arith.truncf %258 : vector<8x64xf32> to vector<8x64xbf16>
    %c1_106 = arith.constant 1 : index
    %c0_107 = arith.constant 0 : index
    %c0_108 = arith.constant 0 : index
    %260 = vector.load %arg12[%c1_106, %c0_107, %c0_108] : memref<2x64x32xbf16, #tpu.memory_space<vmem>>, vector<1x64x32xbf16>
    %261 = vector.shape_cast %260 : vector<1x64x32xbf16> to vector<64x32xbf16>
    %cst_109 = arith.constant dense<0.000000e+00> : vector<8x32xf32>
    %262 = tpu.matmul %259, %261, %cst_109 {dimension_numbers = #tpu.dot_dimension_numbers<[1], [0], [0], [1], [0, 0, 1, 1], [], []>} : vector<8x64xbf16>, vector<64x32xbf16>, vector<8x32xf32> -> vector<8x32xf32>
    %c1_110 = arith.constant 1 : index
    %c0_111 = arith.constant 0 : index
    %c0_112 = arith.constant 0 : index
    %263 = vector.load %arg13[%c1_110, %c0_111, %c0_112] : memref<2x1x32xf32, #tpu.memory_space<vmem>>, vector<1x1x32xf32>
    %264 = vector.shape_cast %263 : vector<1x1x32xf32> to vector<1x32xf32>
    %265 = vector.broadcast %264 : vector<1x32xf32> to vector<8x32xf32>
    %266 = arith.addf %262, %265 : vector<8x32xf32>
    %267 = arith.addf %266, %248 : vector<8x32xf32>
    %c1_113 = arith.constant 1 : index
    %c0_114 = arith.constant 0 : index
    %c0_115 = arith.constant 0 : index
    %268 = vector.load %arg14[%c1_113, %c0_114, %c0_115] : memref<2x1x32xf32, #tpu.memory_space<vmem>>, vector<1x1x32xf32>
    %269 = vector.shape_cast %268 : vector<1x1x32xf32> to vector<1x32xf32>
    %c1_116 = arith.constant 1 : index
    %c0_117 = arith.constant 0 : index
    %c0_118 = arith.constant 0 : index
    %270 = vector.load %arg15[%c1_116, %c0_117, %c0_118] : memref<2x1x32xf32, #tpu.memory_space<vmem>>, vector<1x1x32xf32>
    %271 = vector.shape_cast %270 : vector<1x1x32xf32> to vector<1x32xf32>
    %cst_119 = arith.constant dense<0.000000e+00> : vector<8xf32>
    %272 = vector.multi_reduction <add>, %267, %cst_119 [1] : vector<8x32xf32> to vector<8xf32>
    %273 = vector.shape_cast %272 : vector<8xf32> to vector<8x1xf32>
    %cst_120 = arith.constant 3.125000e-02 : f32
    %274 = vector.broadcast %cst_120 : f32 to vector<8x1xf32>
    %275 = arith.mulf %273, %274 : vector<8x1xf32>
    %276 = arith.mulf %267, %267 : vector<8x32xf32>
    %cst_121 = arith.constant dense<0.000000e+00> : vector<8xf32>
    %277 = vector.multi_reduction <add>, %276, %cst_121 [1] : vector<8x32xf32> to vector<8xf32>
    %278 = vector.shape_cast %277 : vector<8xf32> to vector<8x1xf32>
    %cst_122 = arith.constant 3.125000e-02 : f32
    %279 = vector.broadcast %cst_122 : f32 to vector<8x1xf32>
    %280 = arith.mulf %278, %279 : vector<8x1xf32>
    %281 = arith.mulf %275, %275 : vector<8x1xf32>
    %282 = arith.subf %280, %281 : vector<8x1xf32>
    %cst_123 = arith.constant 0.000000e+00 : f32
    %283 = vector.broadcast %cst_123 : f32 to vector<8x1xf32>
    %284 = arith.maximumf %282, %283 : vector<8x1xf32>
    %285 = vector.broadcast %275 : vector<8x1xf32> to vector<8x32xf32>
    %286 = arith.subf %267, %285 : vector<8x32xf32>
    %cst_124 = arith.constant 9.99999997E-7 : f32
    %287 = vector.broadcast %cst_124 : f32 to vector<8x1xf32>
    %288 = arith.addf %284, %287 : vector<8x1xf32>
    %289 = math.rsqrt %288 : vector<8x1xf32>
    %290 = vector.broadcast %289 : vector<8x1xf32> to vector<8x32xf32>
    %291 = arith.mulf %286, %290 : vector<8x32xf32>
    %292 = vector.broadcast %269 : vector<1x32xf32> to vector<8x32xf32>
    %293 = arith.mulf %291, %292 : vector<8x32xf32>
    %294 = vector.broadcast %271 : vector<1x32xf32> to vector<8x32xf32>
    %295 = arith.addf %293, %294 : vector<8x32xf32>
    %c0_125 = arith.constant 0 : index
    %c0_126 = arith.constant 0 : index
    %c0_127 = arith.constant 0 : index
    %296 = vector.load %arg16[%c0_125, %c0_126, %c0_127] : memref<1x8x32xf32, #tpu.memory_space<vmem>>, vector<1x8x32xf32>
    %297 = vector.shape_cast %296 : vector<1x8x32xf32> to vector<8x32xf32>
    %298 = vector.shape_cast %295 : vector<8x32xf32> to vector<1x8x32xf32>
    tpu.vector_store %arg16[%c0_125, %c0_126, %c0_127], %298 {strides = array<i32>} : memref<1x8x32xf32, #tpu.memory_space<vmem>>, vector<1x8x32xf32>,
    return
  }
  func.func @transform_0(%arg0: i32) -> (i32, i32, i32) {
    %c0_i32 = arith.constant 0 : i32
    %c0_i32_0 = arith.constant 0 : i32
    %c0_i32_1 = arith.constant 0 : i32
    return %arg0, %c0_i32, %c0_i32_0 : i32, i32, i32
  }
  func.func @transform_1(%arg0: i32) -> (i32, i32) {
    %c0_i32 = arith.constant 0 : i32
    %c0_i32_0 = arith.constant 0 : i32
    %c0_i32_1 = arith.constant 0 : i32
    return %c0_i32, %c0_i32_0 : i32, i32
  }
  func.func @transform_2(%arg0: i32) -> (i32, i32) {
    %c0_i32 = arith.constant 0 : i32
    %c0_i32_0 = arith.constant 0 : i32
    %c0_i32_1 = arith.constant 0 : i32
    return %c0_i32, %c0_i32_0 : i32, i32
  }
  func.func @transform_3(%arg0: i32) -> (i32, i32) {
    %c0_i32 = arith.constant 0 : i32
    %c0_i32_0 = arith.constant 0 : i32
    %c0_i32_1 = arith.constant 0 : i32
    return %c0_i32, %c0_i32_0 : i32, i32
  }
  func.func @transform_4(%arg0: i32) -> (i32, i32) {
    %c0_i32 = arith.constant 0 : i32
    %c0_i32_0 = arith.constant 0 : i32
    %c0_i32_1 = arith.constant 0 : i32
    return %c0_i32, %c0_i32_0 : i32, i32
  }
  func.func @transform_5(%arg0: i32) -> (i32, i32, i32) {
    %c0_i32 = arith.constant 0 : i32
    %c0_i32_0 = arith.constant 0 : i32
    %c0_i32_1 = arith.constant 0 : i32
    %c0_i32_2 = arith.constant 0 : i32
    return %c0_i32, %c0_i32_0, %c0_i32_1 : i32, i32, i32
  }
  func.func @transform_6(%arg0: i32) -> (i32, i32, i32) {
    %c0_i32 = arith.constant 0 : i32
    %c0_i32_0 = arith.constant 0 : i32
    %c0_i32_1 = arith.constant 0 : i32
    %c0_i32_2 = arith.constant 0 : i32
    return %c0_i32, %c0_i32_0, %c0_i32_1 : i32, i32, i32
  }
  func.func @transform_7(%arg0: i32) -> (i32, i32, i32) {
    %c0_i32 = arith.constant 0 : i32
    %c0_i32_0 = arith.constant 0 : i32
    %c0_i32_1 = arith.constant 0 : i32
    %c0_i32_2 = arith.constant 0 : i32
    return %c0_i32, %c0_i32_0, %c0_i32_1 : i32, i32, i32
  }
  func.func @transform_8(%arg0: i32) -> (i32, i32, i32) {
    %c0_i32 = arith.constant 0 : i32
    %c0_i32_0 = arith.constant 0 : i32
    %c0_i32_1 = arith.constant 0 : i32
    %c0_i32_2 = arith.constant 0 : i32
    return %c0_i32, %c0_i32_0, %c0_i32_1 : i32, i32, i32
  }
  func.func @transform_9(%arg0: i32) -> (i32, i32, i32) {
    %c0_i32 = arith.constant 0 : i32
    %c0_i32_0 = arith.constant 0 : i32
    %c0_i32_1 = arith.constant 0 : i32
    %c0_i32_2 = arith.constant 0 : i32
    return %c0_i32, %c0_i32_0, %c0_i32_1 : i32, i32, i32
  }
  func.func @transform_10(%arg0: i32) -> (i32, i32, i32) {
    %c0_i32 = arith.constant 0 : i32
    %c0_i32_0 = arith.constant 0 : i32
    %c0_i32_1 = arith.constant 0 : i32
    %c0_i32_2 = arith.constant 0 : i32
    return %c0_i32, %c0_i32_0, %c0_i32_1 : i32, i32, i32
  }
  func.func @transform_11(%arg0: i32) -> (i32, i32, i32) {
    %c0_i32 = arith.constant 0 : i32
    %c0_i32_0 = arith.constant 0 : i32
    %c0_i32_1 = arith.constant 0 : i32
    %c0_i32_2 = arith.constant 0 : i32
    return %c0_i32, %c0_i32_0, %c0_i32_1 : i32, i32, i32
  }
  func.func @transform_12(%arg0: i32) -> (i32, i32, i32) {
    %c0_i32 = arith.constant 0 : i32
    %c0_i32_0 = arith.constant 0 : i32
    %c0_i32_1 = arith.constant 0 : i32
    %c0_i32_2 = arith.constant 0 : i32
    return %c0_i32, %c0_i32_0, %c0_i32_1 : i32, i32, i32
  }
  func.func @transform_13(%arg0: i32) -> (i32, i32, i32) {
    %c0_i32 = arith.constant 0 : i32
    %c0_i32_0 = arith.constant 0 : i32
    %c0_i32_1 = arith.constant 0 : i32
    %c0_i32_2 = arith.constant 0 : i32
    return %c0_i32, %c0_i32_0, %c0_i32_1 : i32, i32, i32
  }
  func.func @transform_14(%arg0: i32) -> (i32, i32, i32) {
    %c0_i32 = arith.constant 0 : i32
    %c0_i32_0 = arith.constant 0 : i32
    %c0_i32_1 = arith.constant 0 : i32
    %c0_i32_2 = arith.constant 0 : i32
    return %c0_i32, %c0_i32_0, %c0_i32_1 : i32, i32, i32
  }
  func.func @transform_15(%arg0: i32) -> (i32, i32, i32) {
    %c0_i32 = arith.constant 0 : i32
    %c0_i32_0 = arith.constant 0 : i32
    %c0_i32_1 = arith.constant 0 : i32
    return %arg0, %c0_i32, %c0_i32_0 : i32, i32, i32
  }
}

</mosaic_0001>

<bundles_post_ra>
// kernel: _lambda_.1
= control target key start
LH: loop header
LB: loop body
LE: loop exit
PB: predicated region body
PF: predicated region fallthrough
CT: control target
= control target key end

     0   :  { %s3544_s0 = inlined_call_operand.vmem [shape: s32[2,8,4], index: 0, kind: input, shape index: {}]   ;;  %s3545_s1 = inlined_call_operand.hbm [shape: f32[32,32], index: 1, kind: input, shape index: {}]   ;;  %s3546_s2 = inlined_call_operand.vmem [shape: f32[8,32], index: 2, kind: input, shape index: {}]   ;;  %s3547_s3 = inlined_call_operand.vmem [shape: f32[1,32], index: 3, kind: input, shape index: {}]   ;;  %s3548_s4 = inlined_call_operand.vmem [shape: f32[1,32], index: 4, kind: input, shape index: {}]   ;;  %s3549_s5 = inlined_call_operand.hbm [shape: bf16[2,32,96], index: 5, kind: input, shape index: {}]   ;;  %s3550_s6 = inlined_call_operand.hbm [shape: bf16[2,32,32], index: 6, kind: input, shape index: {}]   ;;  %s3551_s7 = inlined_call_operand.vmem [shape: f32[2,1,32], index: 7, kind: input, shape index: {}, may-alias: {7,13}]   ;;  %s3552_s8 = inlined_call_operand.vmem [shape: f32[2,1,32], index: 8, kind: input, shape index: {}, may-alias: {8,12,14}]   ;;  %s3553_s9 = inlined_call_operand.hbm [shape: bf16[2,32,64], index: 9, kind: input, shape index: {}]   ;;  %s3554_s10 = inlined_call_operand.vmem [shape: f32[2,1,64], index: 10, kind: input, shape index: {}]   ;;  %s3555_s11 = inlined_call_operand.vmem [shape: bf16[2,64,32], index: 11, kind: input, shape index: {}]   ;;  %s3556_s12 = inlined_call_operand.vmem [shape: f32[2,1,32], index: 12, kind: input, shape index: {}, may-alias: {8,12,14}]   ;;  %s3557_s13 = inlined_call_operand.vmem [shape: f32[2,1,32], index: 13, kind: input, shape index: {}, may-alias: {7,13}]   ;;  %s3558_s14 = inlined_call_operand.vmem [shape: f32[2,1,32], index: 14, kind: input, shape index: {}, may-alias: {8,12,14}]   ;;  %s3559_s15 = inlined_call_operand.hbm [shape: f32[2,8,32], index: 15, kind: output, shape index: {}]  }
   0x1   :  { %3572 = sst [smem:[#allocation21_spill]] %s3544_s0 }
   0x2   :  { %3573 = sst [smem:[#allocation22_spill]] %s3559_s15 }
   0x3   :  { %20 = vsyncpa [#allocation3], 0 }
   0x4   :  { %21 = vsyncpa [#allocation6], 0 }
   0x5   :  { %22 = vsyncpa [#allocation9], 0 }
   0x6   :  { %23 = vsyncpa [#allocation4], 0 }
   0x7   :  { %25 = vsyncpa [#allocation4 + $0x1], 0  ;;  %s3126_s18 = smov 0   ;;  %s3128_s19 = smov 0  }
   0x8   :  { %s3130_s20 = smov 0   ;;  %s3132_s21 = smov 0  }
   0x9 LB: > { %3574 = sst [smem:[#allocation15_spill]] %s3013_s18  ;;  %s3147_s22 = sadd.s32 4294967295, %s3025_s21   ;;  %s3025_s21 = sphi %s3132_s21, %s3597_s21   ;;  %s3021_s20 = sphi %s3130_s20, %s3599_s20   ;;  %s3017_s19 = sphi %s3128_s19, %s3601_s19   ;;  %s3013_s18 = sphi %s3126_s18, %s3600_s18  }
   0xa   : > { %3575 = sst [smem:[#allocation16_spill]] %s3021_s20  ;;  %s2358_s23 = sadd.s32 4294967294, %s3025_s21  }
   0xb   : > { %3576 = sst [smem:[#allocation17_spill]] %s3025_s21  ;;  %s3151_s24 = sadd.s32 1, %s3025_s21  }
   0xc   : > { %3577 = sst [smem:[#allocation18_spill]] %s3151_s24  ;;  %s358_s25 = sadd.s32 1, %s3021_s20 }
   0xd   : > { %s355_s26 = ssub.s32 %s3025_s21, %s3151_s24  ;;  %p368_p0 = scmp.ne.s32.totalorder %s3021_s20, %s3017_s19 }
   0xe   : > { %p356_p1 = scmp.eq.s32.totalorder %s355_s26, 0  ;;  %p369_p2 = scmp.eq.s32.totalorder %s3147_s22, 1 }
   0xf   : > { %p374_p3 = scmp.ne.s32.totalorder %s3017_s19, %s3013_s18  ;;  %p375_p4 = scmp.eq.s32.totalorder %s2358_s23, 1 }
  0x10   : > { %s3162_s27 = scalar_select %p356_p1, %s3021_s20, %s358_s25  }
  0x11   : > { %p3164_p5 = por %p369_p2, %p368_p0  ;;  %p3168_p6 = por %p375_p4, %p374_p3 }
  0x12   : > { %3578 = sst [smem:[#allocation19_spill]] %s3162_s27  ;;  %p2359_p7 = scmp.ge.s32.totalorder %s3025_s21, 1 }
  0x13   : > { %s3580_s29 = scalar_select %p3168_p6, 1, 0 }
  0x14   : > { %p382_p8 = scmp.lt.s32.totalorder %s3025_s21, 3  ;;  %p3571_p9 = scmp.eq.s32.totalorder %s3147_s22, 0 }
  0x15   : > { %3581 = sst [smem:[#allocation20_spill]] %s3580_s29  ;;  %s3027_s16 = smov [#allocation5]  }
  0x16   : > { %p3175_p10 = pnand %p2359_p7, %p382_p8  ;;  %s416_s17 = sshll.u32 %s3027_s16, 4  ;;  %s417_s17 = int_to_ptr.vmem [resolvable:$true] %s416_s17 }
  0x17   : > { %s3028_s25 = smov [#allocation2]   ;;  %s2860_s27 = scalar_lea.vmem %s417_s17, 512 }
  0x18   : > { %p2722_p11 = pneg %p3175_p10  ;;  %s394_s26 = sshll.u32 %s3028_s25, 4  ;;  %s395_s26 = int_to_ptr.vmem [resolvable:$true] %s394_s26 }
  0x19   : > { %p2861_p0 = scmp.ne.s32.totalorder %s417_s17, %s2860_s27  ;;  %p2868_p3 = scmp.lt.s32.totalorder %s417_s17, %s417_s17 }
  0x1a   : > { %p3183_p12 = pnand %p3571_p9, %p2722_p11  ;;  %p2869_p4 = scmp.lt.s32.totalorder %s2860_s27, %s2860_s27 }
  0x1c   : > { %p2851_p13 = pneg %p3183_p12  ;;  %p2870_p7 = por %p2869_p4, %p2868_p3 }
  0x1e   : > { %p2863_p1 = pnand %p2861_p0, %p2851_p13 }
  0x20   : > { %p2864_p2 = pneg %p2863_p1 }
  0x22   : > { %p2871_p8 = pnand %p2870_p7, %p2864_p2 }
  0x24   : > { %2874 = shalt.err (!%p2871_p8)
}
  0x25   : > { %s3567_s16 = smov 64   ;;  %s3569_s20 = smov 4  }
  0x26   : > { %2728 = dma.hbm_to_vmem [thread:$0]  (!%p3183_p12), %s3549_s5, 512, %s417_s17, [#allocation6], %s3567_s16, %s3567_s16, %s3569_s20  }
  0x27   : > { %s2886_s29 = scalar_lea.vmem %s395_s26, 512  ;;  %p2894_p2 = scmp.lt.s32.totalorder %s395_s26, %s395_s26 }
  0x28   : > { %p2887_p11 = scmp.ne.s32.totalorder %s395_s26, %s2886_s29  ;;  %p2895_p3 = scmp.lt.s32.totalorder %s2886_s29, %s2886_s29 }
  0x2a   : > { %p2889_p0 = pnand %p2887_p11, %p2851_p13  ;;  %p2896_p4 = por %p2895_p3, %p2894_p2 }
  0x2c   : > { %p2890_p1 = pneg %p2889_p0 }
  0x2e   : > { %p2897_p7 = pnand %p2896_p4, %p2890_p1 }
  0x30   : > { %2900 = shalt.err (!%p2897_p7)
}
  0x31   : > { %s3031_s27 = smov 128   ;;  %s3032_s18 = smov 8  }
  0x32   : > { %2725 = dma.hbm_to_vmem [thread:$0]  (!%p3183_p12), %s3545_s1, 512, %s395_s26, [#allocation3], %s3031_s27, %s3031_s27, %s3032_s18  }
  0x33   : > { %s3033_s24 = smov [#allocation7]   ;;  %s3034_s25 = smov [#allocation8]  }
  0x34   : > { %s429_s17 = sshll.u32 %s3033_s24, 4  ;;  %s448_s16 = sshll.u32 %s3034_s25, 4  ;;  %s430_s17 = int_to_ptr.vmem [resolvable:$true] %s429_s17  ;;  %s449_s16 = int_to_ptr.vmem [resolvable:$true] %s448_s16 }
  0x35   : > { %s2912_s20 = scalar_lea.vmem %s430_s17, 512  ;;  %p2920_p1 = scmp.lt.s32.totalorder %s430_s17, %s430_s17 }
  0x36   : > { %p2913_p8 = scmp.ne.s32.totalorder %s430_s17, %s2912_s20  ;;  %p2921_p2 = scmp.lt.s32.totalorder %s2912_s20, %s2912_s20 }
  0x38   : > { %p2915_p11 = pnand %p2913_p8, %p2851_p13  ;;  %p2922_p3 = por %p2921_p2, %p2920_p1 }
  0x3a   : > { %p2916_p0 = pneg %p2915_p11 }
  0x3c   : > { %p2923_p4 = pnand %p2922_p3, %p2916_p0 }
  0x3e   : > { %2926 = shalt.err (!%p2923_p4)
}
  0x3f   : > { %s3584_s15 = smov 4   ;;  %s3585_s18 = smov 64  }
  0x40   : > { %2731 = dma.hbm_to_vmem [thread:$0]  (!%p3183_p12), %s3550_s6, 512, %s430_s17, [#allocation6], %s3585_s18, %s3585_s18, %s3584_s15  }
  0x41   : > { %s2938_s26 = scalar_lea.vmem %s449_s16, 512  ;;  %p2946_p9 = scmp.lt.s32.totalorder %s449_s16, %s449_s16 }
  0x42   : > { %p2939_p7 = scmp.ne.s32.totalorder %s449_s16, %s2938_s26  ;;  %p2947_p1 = scmp.lt.s32.totalorder %s2938_s26, %s2938_s26 }
  0x44   : > { %p2941_p8 = pnand %p2939_p7, %p2851_p13  ;;  %p2948_p0 = por %p2947_p1, %p2946_p9 }
  0x46   : > { %p2942_p11 = pneg %p2941_p8 }
  0x48   : > { %p2949_p2 = pnand %p2948_p0, %p2942_p11 }
  0x4a   : > { %2952 = shalt.err (!%p2949_p2)
}
  0x4b   : > { %2734 = dma.hbm_to_vmem [thread:$0]  (!%p3183_p12), %s3553_s9, 512, %s449_s16, [#allocation9], %s3585_s18, %s3585_s18, %s3584_s15  }
  0x4c   : > { %486 = sbr.rel (%p3175_p10) target bundleno = 5015 (0x1397), region = 80  ;;  %p3586_p13 = scmp.eq.s32.totalorder (!%p3175_p10), %s3147_s22, 0 }
  0x51   : > { %2996 = dma.done.wait (%p3586_p13), [#allocation3], 512   ;;  %p3587_p3 = pmov %p3586_p13 }
  0x53   : > { %2998 = vsyncadd (%p3587_p3), [#allocation3], 4294966784  ;;  %p3588_p9 = pmov %p3587_p3 }
  0x54   : > { %p3589_p4 = pmov %p3587_p3 }
  0x55   : > { %3000 = dma.done.wait (%p3588_p9), [#allocation6], 1024  }
  0x56   : > { %3002 = vsyncadd (%p3589_p4), [#allocation6], 4294966272  ;;  %p3590_p7 = pmov %p3587_p3 }
  0x57   : > { %p3591_p12 = pmov %p3587_p3 }
  0x58   : > { %3004 = dma.done.wait (%p3590_p7), [#allocation9], 512  }
  0x59   : > { %3006 = vsyncadd (%p3591_p12), [#allocation9], 4294966784  ;;  %p545_p10 = scmp.lt.s32.totalorder %s3147_s22, 1  ;;  %v3035_v0 = vmov 0   ;;  %v3036_v1 = vmov 2   ;;  %v3037_v2 = vmov 0.0   ;;  %v550_v18 = vlaneseq }
  0x5a   : > { %2798 = vset.pattern.permute.xlu0 %v3035_v0  ;;  %2800 = vset.pattern.permute.xlu1 %v3036_v1  ;;  %s3592_s0 = sld [smem:[#allocation21_spill]]  ;;  %v584_v4 = vld [vmem:[#allocation2 + $0x18] sm:$0xff]  ;;  %v583_v6 = vld [vmem:[#allocation2 + $0x10] sm:$0xff]  ;;  %v3038_v7 = vmov 1   ;;  %v3039_v8 = vmov 3   ;;  %v582_v11 = vld [vmem:[#allocation2 + $0x8] sm:$0xff] }
  0x5b   : > { %s546_s30 = scalar_select %p545_p10, %s3147_s22, 1  ;;  %2540 = vmatprep.subr.mxu0 %v3037_v2  ;;  %2518 = vmatprep.subr.mxu1 %v3037_v2  ;;  %v3251_v5 = vand.u32 4294901760, %v584_v4  ;;  %v3254_v10 = vand.u32 4294901760, %v583_v6  ;;  %v3257_v13 = vand.u32 4294901760, %v582_v11  ;;  %v581_v14 = vld [vmem:[#allocation2] sm:$0xff]  ;;  %vm3040_vm0 = vmmov 0  }
  0x5c   : > { %v3263_v16 = vand.u32 4294901760, %v581_v14  ;;  %2548 = vmatprep.mubr.msk.f32.mxu0 %vm3040_vm0, %v3037_v2  ;;  %2526 = vmatprep.mubr.msk.f32.mxu1 %vm3040_vm0, %v3037_v2  ;;  %v551_v19 = vand.u32 127, %v550_v18  ;;  %vm586_vm5 = vcmask 261120   ;;  %v585_v55 = vld [vmem:[%s3546_s2] sm:$0xff]  ;;  %s3041_s20 = smov 112   ;;  %s3042_s27 = smov 96  }
  0x5d   : > { %s2371_s23 = sshll.u32 %s546_s30, 3  ;;  %v695_v9 = vsub.f32 %v584_v4, %v3251_v5  ;;  %v702_v12 = vsub.f32 %v583_v6, %v3254_v10  ;;  %2519 = vmatpush3.msra.mxu1 %v3251_v5  ;;  %v709_v15 = vsub.f32 %v582_v11, %v3257_v13  ;;  %vm1173_vm6 = vcmask 130048   ;;  %s3043_s30 = smov 64  }
  0x5e   : > { %2520 = vmatprep.subr.mxu1 %v3037_v2  ;;  %v716_v17 = vsub.f32 %v581_v14, %v3263_v16  ;;  %vm1268_vm7 = vcmask 64512   ;;  %vm1298_vm8 = vcmask 1043456   ;;  %vm1595_vm9 = vcmask 523264   ;;  %s2441_s29 = sshll.u32 %s3147_s22, 7  ;;  %s3045_s15 = smov [#allocation10]  }
  0x5f   : > { %2541 = vmatpush3.msra.mxu0 %v695_v9  ;;  %2521 = vmatpush3.msra.mxu1 %v3254_v10  ;;  %v696_v33 = vand.u32 4294901760, %v695_v9  ;;  %v703_v35 = vand.u32 4294901760, %v702_v12  ;;  %v710_v38 = vand.u32 4294901760, %v709_v15  ;;  %s2957_s18 = sshll.u32 %s3045_s15, 4  ;;  %s2958_s18 = int_to_ptr.vmem [resolvable:$false] %s2957_s18 }
  0x60   : > { %s548_s17 = scalar_lea.vmem %s3592_s0, %s2371_s23  ;;  %2542 = vmatprep.subr.mxu0 %v3037_v2  ;;  %2522 = vmatprep.subr.mxu1 %v3037_v2  ;;  %v717_v42 = vand.u32 4294901760, %v716_v17  ;;  %s3044_s23 = smov 16  }
  0x61   : > { %v552_v3 = vld [vmem:[%s548_s17] sm:$0xff]  ;;  %2543 = vmatpush3.msra.mxu0 %v702_v12  ;;  %2523 = vmatpush3.msra.mxu1 %v3257_v13  ;;  %v697_v36 = vsub.f32 %v695_v9, %v696_v33  ;;  %v704_v39 = vsub.f32 %v702_v12, %v703_v35  ;;  %v711_v43 = vsub.f32 %v709_v15, %v710_v38  ;;  %s2959_s22 = scalar_lea.vmem %s2958_s18, 256 }
  0x62   : > { %554 = vperm.xlu0 %2798, %v552_v3   ;;  %568 = vperm.xlu1 %2800, %v552_v3   ;;  %v718_v46 = vsub.f32 %v716_v17, %v717_v42  ;;  %v2804_v9 = vld [vmem:[#allocation5] sm:$0xff]  }
  0x63   : > { %2544 = vmatprep.subr.mxu0 %v3037_v2  ;;  %2524 = vmatprep.subr.mxu1 %v3037_v2  ;;  %v698_v41 = vand.u32 4294901760, %v697_v36  ;;  %v705_v45 = vand.u32 4294901760, %v704_v39  ;;  %v712_v47 = vand.u32 4294901760, %v711_v43 }
  0x64   : > { %2545 = vmatpush3.msra.mxu0 %v709_v15  ;;  %2525 = vmatpush3.msra.mxu1 %v3263_v16  ;;  %v719_v48 = vand.u32 4294901760, %v718_v46 }
  0x65   : > { %2546 = vmatprep.subr.mxu0 %v3037_v2  ;;  %2529 = vmatprep.subr.mxu1 %v3037_v2 }
  0x66   : > { %2799 = vset.pattern.permute.xlu0 %v3038_v7  ;;  %2801 = vset.pattern.permute.xlu1 %v3039_v8 }
  0x67   : > { %561 = vperm.xlu0 %2799, %v552_v3   ;;  %575 = vperm.xlu1 %2801, %v552_v3  }
  0x68   : > { %2547 = vmatpush3.msra.mxu0 %v716_v17 }
  0x69   : > { %2562 = vmatprep.subr.mxu0 %v3037_v2 }
  0x6b   : > { %2802 = vset.pattern.permute.xlu0 %v3039_v8  ;;  %v2803_v8 = vld [vmem:[#allocation5 + $0x8] sm:$0xff]  }
  0xdd   : > { %v555_v20 = vpop.permute.xlu0 %554  ;;  %v569_v21 = vpop.permute.xlu1 %568 }
  0xde   : > { %vm556_vm1 = vcmp.eq.s32.totalorder %v555_v20, %v551_v19  ;;  %vm570_vm2 = vcmp.eq.s32.totalorder %v569_v21, %v551_v19  ;;  %v2376_v20 = vld [vmem:[%s3547_s3] ss:$0 sm:$0xff] }
  0xdf   : > { %v2372_v24 = vsel %vm556_vm1, 1.0, %v3037_v2  ;;  %v2374_v27 = vsel %vm570_vm2, 1.0, %v3037_v2 }
  0xe2   : > { %v562_v22 = vpop.permute.xlu0 %561  ;;  %v576_v23 = vpop.permute.xlu1 %575 }
  0xe3   : > { %vm563_vm3 = vcmp.eq.s32.totalorder %v562_v22, %v551_v19  ;;  %vm577_vm4 = vcmp.eq.s32.totalorder %v576_v23, %v551_v19  ;;  %v2377_v22 = vld [vmem:[%s3548_s4] ss:$0 sm:$0xff] }
  0xe4   : > { %v2373_v25 = vsel %vm563_vm3, 1.0, %v3037_v2  ;;  %v2375_v28 = vsel %vm577_vm4, 1.0, %v3037_v2 }
  0xe5   : > { %v566_v26 = vadd.f32 %v2373_v25, %v2372_v24 }
  0xe7   : > { %v573_v29 = vadd.f32 %v2374_v27, %v566_v26 }
  0xe9   : > { %v580_v30 = vadd.f32 %v2375_v28, %v573_v29 }
  0xeb   : > { %v588_v31 = vsel %vm586_vm5, %v580_v30, 0 }
  0xec   : > { %v659_v32 = vand.u32 4294901760, %v588_v31 }
  0xee   : > { %v660_v34 = vsub.f32 %v588_v31, %v659_v32 }
  0xf0   : > { %2549 = vmatmul.mubr.f32.vlgmr.msra.gmra.mxu0 %v660_v34  ;;  %v661_v37 = vand.u32 4294901760, %v660_v34 }
  0xf1   : > { %2563 = vmatpush3.msra.mxu0 %v696_v33  ;;  %2570 = vmatprep.mubr.msk.f32.mxu0 %vm3040_vm0, %v3037_v2 }
  0xf2   : > { %2564 = vmatprep.subr.mxu0 %v3037_v2  ;;  %v662_v40 = vsub.f32 %v660_v34, %v661_v37 }
  0xf3   : > { %2565 = vmatpush3.msra.mxu0 %v703_v35 }
  0xf4   : > { %2566 = vmatprep.subr.mxu0 %v3037_v2  ;;  %v663_v44 = vand.u32 4294901760, %v662_v40 }
  0xf5   : > { %2567 = vmatpush3.msra.mxu0 %v710_v38 }
  0xf6   : > { %2568 = vmatprep.subr.mxu0 %v3037_v2  ;;  %2527 = vmatmul.mubr.f32.vlgmr.msra.gmra.mxu1 %v663_v44 }
  0xf7   : > { %2530 = vmatpush3.msra.mxu1 %v698_v41  ;;  %2569 = vmatpush3.msra.mxu0 %v717_v42 }
  0xf8   : > { %2531 = vmatprep.subr.mxu1 %v3037_v2  ;;  %2571 = vmatmul.mubr.f32.vlgmr.msra.gmra.mxu0 %v659_v32 }
  0xf9   : > { %2532 = vmatpush3.msra.mxu1 %v705_v45  ;;  %2537 = vmatprep.mubr.msk.f32.mxu1 %vm3040_vm0, %v3037_v2 }
  0xfa   : > { %2533 = vmatprep.subr.mxu1 %v3037_v2  ;;  %2584 = vmatprep.subr.bf16.mxu0 %v3037_v2 }
  0xfb   : > { %2534 = vmatpush3.msra.mxu1 %v712_v47  ;;  %2588 = vmatprep.mubr.msk.bf16.mxu0 %vm3040_vm0, %v3037_v2 }
  0xfc   : > { %2535 = vmatprep.subr.mxu1 %v3037_v2  ;;  %2585 = vmatpush3.bf16.msra.mxu0 %v2803_v8 }
  0xfd   : > { %2536 = vmatpush3.msra.mxu1 %v719_v48  ;;  %2586 = vmatprep.subr.bf16.mxu0 %v3037_v2 }
  0xfe   : > { %2538 = vmatmul.mubr.f32.vlgmr.msra.gmra.mxu1 %v659_v32  ;;  %2551 = vmatprep.subr.mxu1 %v3037_v2 }
  0xff   : > { %2552 = vmatpush3.msra.mxu1 %v3251_v5  ;;  %2559 = vmatprep.mubr.msk.f32.mxu1 %vm3040_vm0, %v3037_v2 }
 0x100   : > { %2553 = vmatprep.subr.mxu1 %v3037_v2  ;;  %2587 = vmatpush3.bf16.msra.mxu0 %v2804_v9 }
 0x101   : > { %2554 = vmatpush3.msra.mxu1 %v3254_v10  ;;  %2598 = vmatprep.subr.bf16.mxu0 %v3037_v2 }
 0x102   : > { %2555 = vmatprep.subr.mxu1 %v3037_v2 }
 0x103   : > { %2556 = vmatpush3.msra.mxu1 %v3257_v13 }
 0x104   : > { %2557 = vmatprep.subr.mxu1 %v3037_v2 }
 0x105   : > { %2558 = vmatpush3.msra.mxu1 %v3263_v16 }
 0x106   : > { %2560 = vmatmul.mubr.f32.vlgmr.msra.gmra.mxu1 %v661_v37  ;;  %2573 = vmatprep.subr.mxu1 %v3037_v2 }
 0x107   : > { %2574 = vmatpush3.msra.mxu1 %v3251_v5  ;;  %2581 = vmatprep.mubr.msk.f32.mxu1 %vm3040_vm0, %v3037_v2 }
 0x108   : > { %2575 = vmatprep.subr.mxu1 %v3037_v2 }
 0x109   : > { %2576 = vmatpush3.msra.mxu1 %v3254_v10 }
 0x10a   : > { %2577 = vmatprep.subr.mxu1 %v3037_v2 }
 0x10b   : > { %2578 = vmatpush3.msra.mxu1 %v3257_v13 }
 0x10c   : > { %2579 = vmatprep.subr.mxu1 %v3037_v2 }
 0x10d   : > { %2580 = vmatpush3.msra.mxu1 %v3263_v16 }
 0x10e   : > { %2582 = vmatmul.mubr.f32.vlgmr.msra.gmra.mxu1 %v659_v32  ;;  %2592 = vmatprep.subr.bf16.mxu1 %v3037_v2 }
 0x10f   : > { %2594 = vmatprep.mubr.msk.bf16.mxu1 %vm3040_vm0, %v3037_v2 }
 0x1b0   : > { %v836_v49 = vpop.f32.mrf.mxu0 }
 0x1b2   : > { %v2550_v50 = vpop.f32.mrf.mxu0 }
 0x1b6   : > { %v665_v51 = vpop.f32.mrf.mxu1 }
 0x1b7   : > { %v666_v58 = vadd.f32 %v665_v51, %v585_v55 }
 0x1b8   : > { %v996_v52 = vpop.f32.mrf.mxu0  ;;  %v2528_v53 = vpop.f32.mrf.mxu1 }
 0x1ba   : > { %v2572_v54 = vpop.f32.mrf.mxu0 }
 0x1be   : > { %v756_v56 = vpop.f32.mrf.mxu1 }
 0x1bf   : > { %v757_v59 = vadd.f32 %v756_v56, %v666_v58 }
 0x1c0   : > { %v2539_v57 = vpop.f32.mrf.mxu1 }
 0x1c1   : > { %v837_v61 = vadd.f32 %v836_v49, %v757_v59 }
 0x1c6   : > { %v913_v60 = vpop.f32.mrf.mxu1 }
 0x1c7   : > { %v914_v63 = vadd.f32 %v913_v60, %v837_v61 }
 0x1c8   : > { %v2561_v62 = vpop.f32.mrf.mxu1 }
 0x1c9   : > { %v997_v0 = vadd.f32 %v996_v52, %v914_v63 }
 0x1ce   : > { %v1071_v1 = vpop.f32.mrf.mxu1 }
 0x1cf   : > { %v1072_v3 = vadd.f32 %v1071_v1, %v997_v0 }
 0x1d0   : > { %v2583_v4 = vpop.f32.mrf.mxu1 }
 0x1d1   : > { %v1077_v5 = vsel %vm586_vm5, %v1072_v3, 0.0  ;;  %v1081_v6 = vmul.f32 %v1072_v3, %v1072_v3 }
 0x1d2   : > { %1078 = vadd.xlane.f32.xlu1 %v1077_v5  ;;  %v2805_v5 = vld [vmem:[#allocation7 + $0x8] sm:$0xff]  }
 0x1d3   : > { %v1082_v7 = vsel %vm586_vm5, %v1081_v6, 0.0  ;;  %v2806_v6 = vld [vmem:[#allocation7] sm:$0xff]  }
 0x1d4   : > { %1083 = vadd.xlane.f32.xlu0 %v1082_v7 }
 0x25b   : > { %v1079_v10 = vpop.xlane.xlu1 %1078 }
 0x25c   : > { %v1080_v11 = vmul.f32 0.03125, %v1079_v10 }
 0x25d   : > { %v1084_v12 = vpop.xlane.xlu0 %1083 }
 0x25e   : > { %v1086_v13 = vmul.f32 %v1080_v11, %v1080_v11  ;;  %v1085_v14 = vmul.f32 0.03125, %v1084_v12  ;;  %v1089_v18 = vsub.f32 %v1072_v3, %v1080_v11 }
 0x260   : > { %v1087_v15 = vsub.f32 %v1085_v14, %v1086_v13 }
 0x262   : > { %v1088_v16 = vmax.f32 %v1087_v15, 0.0 }
 0x264   : > { %v1090_v17 = vadd.f32 1e-06, %v1088_v16 }
 0x266   : > { %2823 = vrsqrt.f32 %v1090_v17 }
 0x273   : > { %v2824_v19 = vpop.eup %2823 }
 0x274   : > { %v1092_v21 = vmul.f32 %v2824_v19, %v1089_v18 }
 0x276   : > { %v1099_v23 = vmul.f32 %v2376_v20, %v1092_v21 }
 0x278   : > { %v3333_v24 = vadd.f32 %v2377_v22, %v1099_v23 }
 0x27a   : > { %v1107_v25 = vpack.c.bf16 %v3333_v24, %v3333_v24 }
 0x27c   : > { %2589 = vmatmul.mubr.msk.bf16.vlgmr.msra.gmra.mxu0 %vm586_vm5, %v1107_v25 }
 0x27d   : > { %2600 = vmatprep.mubr.msk.bf16.mxu0 %vm3040_vm0, %v3037_v2 }
 0x33c   : > { %v1161_v26 = vpop.f32.mrf.mxu0 }
 0x33d   : > { %v1167_v27 = vpack.c.bf16 %v1161_v26, %v1161_v26 }
 0x33e   : > { %v2590_v28 = vpop.f32.mrf.mxu0 }
 0x33f   : > { %1169 = vrot.lane.b32.xlu0 %v1167_v27, %s3041_s20  ;;  %v2808_v28 = vld [vmem:[#allocation8] sm:$0xff]  }
 0x340   : > { %v1164_v29 = vpop.f32.mrf.mxu0 }
 0x341   : > { %v2810_v29 = vld [vmem:[%s3555_s11 + $0x10] sm:$0xff]  }
 0x342   : > { %v2591_v30 = vpop.f32.mrf.mxu0 }
 0x3b1   : > { %v1170_v31 = vpop.permute.xlu0 %1169 }
 0x3b2   : > { %1220 = vrot.lane.b32.xlu1 %v1170_v31, %s3042_s27 }
 0x3b6   : > { %1171 = vrot.lane.b32.xlu1 %v1167_v27, %s3042_s27 }
 0x424   : > { %v1221_v32 = vpop.permute.xlu1 %1220 }
 0x425   : > { %v1226_v33 = vsel %vm1173_vm6, %v1221_v32, 0 }
 0x426   : > { %2599 = vmatpush3.bf16.xpose.msra.mxu0 %v1226_v33 }
 0x427   : > { %2610 = vmatprep.subr.bf16.mxu0 %v3037_v2 }
 0x428   : > { %v1172_v34 = vpop.permute.xlu1 %1171 }
 0x429   : > { %v1178_v35 = vsel %vm1173_vm6, %v1172_v34, 0 }
 0x42a   : > { %2593 = vmatpush3.bf16.xpose.msra.mxu1 %v1178_v35 }
 0x42b   : > { %2604 = vmatprep.subr.bf16.mxu1 %v3037_v2 }
 0x42d   : > { %2601 = vmatmul.mubr.msk.bf16.vlgmr.msra.gmra.mxu0 %vm1173_vm6, %v1170_v31 }
 0x42e   : > { %2612 = vmatprep.mubr.msk.bf16.mxu0 %vm3040_vm0, %v3037_v2 }
 0x431   : > { %2595 = vmatmul.mubr.msk.bf16.vlgmr.msra.gmra.mxu1 %vm1173_vm6, %v1167_v27 }
 0x432   : > { %2606 = vmatprep.mubr.msk.bf16.mxu1 %vm3040_vm0, %v3037_v2 }
 0x4ed   : > { %v1262_v36 = vpop.f32.mrf.mxu0 }
 0x4ee   : > { %v1272_v37 = vsel %vm1268_vm7, %v1262_v36, -inf }
 0x4ef   : > { %1273 = vmax.xlane.f32.xlu0 %v1272_v37  ;;  %v2602_v38 = vpop.f32.mrf.mxu0 }
 0x4f1   : > { %v1214_v39 = vpop.f32.mrf.mxu1  ;;  %v1265_v40 = vpop.f32.mrf.mxu0 }
 0x4f2   : > { %v1269_v41 = vsel %vm1268_vm7, %v1214_v39, -inf  ;;  %v2388_v40 = vld [vmem:[%s3551_s7] ss:$0 sm:$0xff] }
 0x4f3   : > { %v2603_v42 = vpop.f32.mrf.mxu0  ;;  %1270 = vmax.xlane.f32.xlu1 %v1269_v41  ;;  %v2596_v43 = vpop.f32.mrf.mxu1 }
 0x4f4   : > { %v2389_v42 = vld [vmem:[%s3552_s8] ss:$0 sm:$0xff] }
 0x4f5   : > { %v1217_v44 = vpop.f32.mrf.mxu1 }
 0x4f7   : > { %v2597_v45 = vpop.f32.mrf.mxu1 }
 0x578   : > { %v1274_v46 = vpop.xlane.xlu0 %1273 }
 0x579   : > { %v1276_v47 = vsub.f32 %v1262_v36, %v1274_v46  ;;  %v2811_v46 = vld [vmem:[%s3555_s11 + $0x8] sm:$0xff]  }
 0x57b   : > { %v1279_v48 = vmul.f32 1.442695, %v1276_v47  ;;  %v2812_v47 = vld [vmem:[%s3555_s11] sm:$0xff]  }
 0x57c   : > { %v1271_v49 = vpop.xlane.xlu1 %1270 }
 0x57d   : > { %2825 = vpow2.f32 %v1279_v48  ;;  %v1275_v50 = vsub.f32 %v1214_v39, %v1271_v49  ;;  %v2390_v48 = vld [vmem:[%s3554_s10] ss:$0 sm:$0xff] }
 0x57f   : > { %v1277_v51 = vmul.f32 1.442695, %v1275_v50 }
 0x581   : > { %2827 = vpow2.f32 %v1277_v51 }
 0x58a   : > { %v2826_v52 = vpop.eup %2825 }
 0x58b   : > { %v1284_v53 = vsel %vm1268_vm7, %v2826_v52, 0.0 }
 0x58c   : > { %1285 = vadd.xlane.f32.xlu0 %v1284_v53 }
 0x58e   : > { %v2828_v54 = vpop.eup %2827 }
 0x58f   : > { %v1281_v55 = vsel %vm1268_vm7, %v2828_v54, 0.0 }
 0x590   : > { %1282 = vadd.xlane.f32.xlu1 %v1281_v55 }
 0x5a1   : > { %1293 = vrot.lane.b32.xlu1 %v1167_v27, %s3043_s30  ;;  %v2807_v27 = vld [vmem:[#allocation8 + $0x8] sm:$0xff]  }
 0x5a2   : > { %1342 = vrot.lane.b32.xlu0 %v1170_v31, %s3043_s30 }
 0x615   : > { %v1286_v56 = vpop.xlane.xlu0 %1285 }
 0x616   : > { %2829 = vrcp.f32 %v1286_v56  ;;  %v2394_v56 = vld [vmem:[%s3556_s12] ss:$0 sm:$0xff] }
 0x619   : > { %v1343_v57 = vpop.permute.xlu0 %1342  ;;  %v1283_v58 = vpop.xlane.xlu1 %1282 }
 0x61a   : > { %v1348_v59 = vsel %vm1298_vm8, %v1343_v57, 0  ;;  %2831 = vrcp.f32 %v1283_v58 }
 0x61b   : > { %2611 = vmatpush3.bf16.msra.mxu0 %v1348_v59 }
 0x61c   : > { %2624 = vmatprep.subr.bf16.mxu0 %v3037_v2 }
 0x61d   : > { %v1294_v60 = vpop.permute.xlu1 %1293 }
 0x61e   : > { %v1300_v61 = vsel %vm1298_vm8, %v1294_v60, 0 }
 0x61f   : > { %2605 = vmatpush3.bf16.msra.mxu1 %v1300_v61 }
 0x620   : > { %2616 = vmatprep.subr.bf16.mxu1 %v3037_v2 }
 0x623   : > { %v2830_v62 = vpop.eup %2829 }
 0x624   : > { %v1290_v63 = vmul.f32 %v2830_v62, %v2826_v52 }
 0x626   : > { %v1292_v0 = vpack.c.bf16 %v1290_v63, %v1290_v63 }
 0x627   : > { %v2832_v1 = vpop.eup %2831 }
 0x628   : > { %2613 = vmatmul.mubr.msk.bf16.vlgmr.msra.gmra.mxu0 %vm1268_vm7, %v1292_v0  ;;  %v1289_v3 = vmul.f32 %v2832_v1, %v2828_v54 }
 0x629   : > { %2628 = vmatprep.mubr.msk.bf16.mxu0 %vm3040_vm0, %v3037_v2  ;;  %2625 = vmatpush3.bf16.msra.mxu0 %v2807_v27 }
 0x62a   : > { %v1291_v4 = vpack.c.bf16 %v1289_v3, %v1289_v3  ;;  %2626 = vmatprep.subr.bf16.mxu0 %v3037_v2  ;;  %v2813_v3 = vld [vmem:[#allocation5 + $0x18] sm:$0xff]  }
 0x62c   : > { %2607 = vmatmul.mubr.msk.bf16.vlgmr.msra.gmra.mxu1 %vm1268_vm7, %v1291_v4  ;;  %v2814_v4 = vld [vmem:[#allocation5 + $0x10] sm:$0xff]  }
 0x62d   : > { %2620 = vmatprep.mubr.msk.bf16.mxu1 %vm3040_vm0, %v3037_v2  ;;  %2617 = vmatpush3.bf16.msra.mxu1 %v2805_v5 }
 0x62e   : > { %2618 = vmatprep.subr.bf16.mxu1 %v3037_v2  ;;  %2627 = vmatpush3.bf16.msra.mxu0 %v2808_v28 }
 0x62f   : > { %2644 = vmatprep.subr.bf16.mxu0 %v3037_v2 }
 0x631   : > { %2619 = vmatpush3.bf16.msra.mxu1 %v2806_v6 }
 0x632   : > { %2632 = vmatprep.subr.bf16.mxu1 %v3037_v2 }
 0x6e8   : > { %v1384_v7 = vpop.f32.mrf.mxu0 }
 0x6e9   : > { %1391 = vrot.lane.b32.xlu0 %v1384_v7, %s3044_s23 }
 0x6ea   : > { %v2614_v8 = vpop.f32.mrf.mxu0 }
 0x6ec   : > { %v1336_v9 = vpop.f32.mrf.mxu1  ;;  %v1387_v10 = vpop.f32.mrf.mxu0 }
 0x6ee   : > { %v2608_v11 = vpop.f32.mrf.mxu1  ;;  %v2615_v12 = vpop.f32.mrf.mxu0 }
 0x6f0   : > { %v1339_v13 = vpop.f32.mrf.mxu1 }
 0x6f2   : > { %v2609_v14 = vpop.f32.mrf.mxu1 }
 0x75b   : > { %v1392_v15 = vpop.permute.xlu0 %1391 }
 0x75c   : > { %v1394_v16 = vsel %vm1173_vm6, %v1336_v9, %v1392_v15  ;;  %v2400_v15 = vld [vmem:[%s3557_s13] ss:$0 sm:$0xff] }
 0x75d   : > { %v1395_v17 = vpack.c.bf16 %v1394_v16, %v1394_v16 }
 0x75f   : > { %2621 = vmatmul.mubr.msk.bf16.vlgmr.msra.gmra.mxu1 %vm586_vm5, %v1395_v17  ;;  %v2401_v17 = vld [vmem:[%s3558_s14] ss:$0 sm:$0xff] }
 0x760   : > { %2640 = vmatprep.mubr.msk.bf16.mxu1 %vm3040_vm0, %v3037_v2 }
 0x81f   : > { %v1449_v18 = vpop.f32.mrf.mxu1 }
 0x820   : > { %v1450_v19 = vadd.f32 %v1449_v18, %v3333_v24  ;;  %v2809_v24 = vld [vmem:[%s3555_s11 + $0x18] sm:$0xff]  }
 0x821   : > { %v2622_v20 = vpop.f32.mrf.mxu1  ;;  %2633 = vmatpush3.bf16.msra.mxu1 %v2809_v24 }
 0x822   : > { %v1457_v21 = vsel %vm586_vm5, %v1450_v19, 0.0  ;;  %v1461_v22 = vmul.f32 %v1450_v19, %v1450_v19  ;;  %2634 = vmatprep.subr.bf16.mxu1 %v3037_v2 }
 0x823   : > { %1458 = vadd.xlane.f32.xlu1 %v1457_v21  ;;  %v1452_v23 = vpop.f32.mrf.mxu1 }
 0x824   : > { %v1462_v25 = vsel %vm586_vm5, %v1461_v22, 0.0 }
 0x825   : > { %1463 = vadd.xlane.f32.xlu0 %v1462_v25  ;;  %v2623_v26 = vpop.f32.mrf.mxu1  ;;  %2635 = vmatpush3.bf16.msra.mxu1 %v2810_v29 }
 0x826   : > { %2636 = vmatprep.subr.bf16.mxu1 %v3037_v2 }
 0x829   : > { %2637 = vmatpush3.bf16.msra.mxu1 %v2811_v46 }
 0x82a   : > { %2638 = vmatprep.subr.bf16.mxu1 %v3037_v2 }
 0x82d   : > { %2639 = vmatpush3.bf16.msra.mxu1 %v2812_v47 }
 0x82e   : > { %2658 = vmatprep.subr.bf16.mxu1 %v3037_v2 }
 0x8ac   : > { %v1459_v30 = vpop.xlane.xlu1 %1458 }
 0x8ad   : > { %v1460_v31 = vmul.f32 0.03125, %v1459_v30 }
 0x8ae   : > { %v1464_v32 = vpop.xlane.xlu0 %1463 }
 0x8af   : > { %v1466_v33 = vmul.f32 %v1460_v31, %v1460_v31  ;;  %v1465_v34 = vmul.f32 0.03125, %v1464_v32  ;;  %v1469_v38 = vsub.f32 %v1450_v19, %v1460_v31 }
 0x8b1   : > { %v1467_v35 = vsub.f32 %v1465_v34, %v1466_v33 }
 0x8b3   : > { %v1468_v36 = vmax.f32 %v1467_v35, 0.0 }
 0x8b5   : > { %v1470_v37 = vadd.f32 1e-06, %v1468_v36 }
 0x8b7   : > { %2833 = vrsqrt.f32 %v1470_v37 }
 0x8c4   : > { %v2834_v39 = vpop.eup %2833 }
 0x8c5   : > { %v1472_v41 = vmul.f32 %v2834_v39, %v1469_v38 }
 0x8c7   : > { %v1479_v43 = vmul.f32 %v2388_v40, %v1472_v41 }
 0x8c9   : > { %v1486_v44 = vadd.f32 %v2389_v42, %v1479_v43 }
 0x8cb   : > { %v1487_v45 = vpack.c.bf16 %v1486_v44, %v1486_v44 }
 0x8cd   : > { %2629 = vmatmul.mubr.msk.bf16.vlgmr.msra.gmra.mxu0 %vm586_vm5, %v1487_v45 }
 0x8ce   : > { %2648 = vmatprep.mubr.msk.bf16.mxu0 %vm3040_vm0, %v3037_v2  ;;  %2645 = vmatpush3.bf16.msra.mxu0 %v2813_v3 }
 0x8cf   : > { %2646 = vmatprep.subr.bf16.mxu0 %v3037_v2 }
 0x8d2   : > { %2647 = vmatpush3.bf16.msra.mxu0 %v2814_v4 }
 0x8d3   : > { %2652 = vmatprep.subr.bf16.mxu0 %v3037_v2 }
 0x98d   : > { %v1548_v49 = vpop.f32.mrf.mxu0 }
 0x98e   : > { %v1549_v50 = vadd.f32 %v2390_v48, %v1548_v49 }
 0x98f   : > { %v2630_v51 = vpop.f32.mrf.mxu0 }
 0x990   : > { %v1554_v52 = vmax.f32 %v1549_v50, 0.0 }
 0x991   : > { %v1551_v53 = vpop.f32.mrf.mxu0 }
 0x992   : > { %v1555_v54 = vpack.c.bf16 %v1554_v52, %v1554_v52 }
 0x993   : > { %v2631_v55 = vpop.f32.mrf.mxu0 }
 0x994   : > { %2641 = vmatmul.mubr.msk.bf16.vlgmr.msra.gmra.mxu1 %vm1595_vm9, %v1555_v54 }
 0x995   : > { %2660 = vmatprep.mubr.msk.bf16.mxu1 %vm3040_vm0, %v3037_v2 }
 0xa54   : > { %v1633_v57 = vpop.f32.mrf.mxu1 }
 0xa55   : > { %v1634_v58 = vadd.f32 %v2394_v56, %v1633_v57 }
 0xa56   : > { %v2642_v59 = vpop.f32.mrf.mxu1 }
 0xa57   : > { %v1639_v60 = vadd.f32 %v1634_v58, %v1486_v44 }
 0xa58   : > { %v1636_v61 = vpop.f32.mrf.mxu1 }
 0xa59   : > { %v1642_v62 = vsel %vm586_vm5, %v1639_v60, 0.0  ;;  %v1646_v63 = vmul.f32 %v1639_v60, %v1639_v60 }
 0xa5a   : > { %1643 = vadd.xlane.f32.xlu0 %v1642_v62  ;;  %v2643_v0 = vpop.f32.mrf.mxu1 }
 0xa5b   : > { %v1647_v1 = vsel %vm586_vm5, %v1646_v63, 0.0  ;;  %v2815_v63 = vld [vmem:[#allocation7 + $0x18] sm:$0xff]   ;;  %v2816_v0 = vld [vmem:[#allocation7 + $0x10] sm:$0xff]  }
 0xa5c   : > { %1648 = vadd.xlane.f32.xlu1 %v1647_v1 }
 0xae3   : > { %v1644_v5 = vpop.xlane.xlu0 %1643 }
 0xae4   : > { %v1645_v6 = vmul.f32 0.03125, %v1644_v5 }
 0xae5   : > { %v1649_v7 = vpop.xlane.xlu1 %1648 }
 0xae6   : > { %v1651_v8 = vmul.f32 %v1645_v6, %v1645_v6  ;;  %v1650_v9 = vmul.f32 0.03125, %v1649_v7  ;;  %v1654_v13 = vsub.f32 %v1639_v60, %v1645_v6 }
 0xae8   : > { %v1652_v10 = vsub.f32 %v1650_v9, %v1651_v8 }
 0xaea   : > { %v1653_v11 = vmax.f32 %v1652_v10, 0.0 }
 0xaec   : > { %v1655_v12 = vadd.f32 1e-06, %v1653_v11 }
 0xaee   : > { %2835 = vrsqrt.f32 %v1655_v12 }
 0xafb   : > { %v2836_v14 = vpop.eup %2835 }
 0xafc   : > { %v1657_v16 = vmul.f32 %v2836_v14, %v1654_v13 }
 0xafe   : > { %v1664_v18 = vmul.f32 %v2400_v15, %v1657_v16 }
 0xb00   : > { %v3425_v19 = vadd.f32 %v2401_v17, %v1664_v18 }
 0xb02   : > { %v1672_v20 = vpack.c.bf16 %v3425_v19, %v3425_v19 }
 0xb04   : > { %2649 = vmatmul.mubr.msk.bf16.vlgmr.msra.gmra.mxu0 %vm586_vm5, %v1672_v20 }
 0xb05   : > { %2654 = vmatprep.mubr.msk.bf16.mxu0 %vm3040_vm0, %v3037_v2 }
 0xbc4   : > { %v1727_v21 = vpop.f32.mrf.mxu0 }
 0xbc5   : > { %v1733_v22 = vpack.c.bf16 %v1727_v21, %v1727_v21 }
 0xbc6   : > { %v2650_v23 = vpop.f32.mrf.mxu0 }
 0xbc7   : > { %1735 = vrot.lane.b32.xlu0 %v1733_v22, %s3041_s20  ;;  %v2818_v23 = vld [vmem:[#allocation8 + $0x10] sm:$0xff]  }
 0xbc8   : > { %v1730_v25 = vpop.f32.mrf.mxu0 }
 0xbc9   : > { %v2820_v25 = vld [vmem:[%s3555_s11 + $0x30] sm:$0xff]  }
 0xbca   : > { %v2651_v26 = vpop.f32.mrf.mxu0 }
 0xc39   : > { %v1736_v27 = vpop.permute.xlu0 %1735 }
 0xc3a   : > { %1785 = vrot.lane.b32.xlu1 %v1736_v27, %s3042_s27 }
 0xc3e   : > { %1737 = vrot.lane.b32.xlu1 %v1733_v22, %s3042_s27  ;;  %s3593_s27 = sld [smem:[#allocation22_spill]] }
 0xcac   : > { %v1786_v28 = vpop.permute.xlu1 %1785 }
 0xcad   : > { %v1791_v24 = vsel %vm1173_vm6, %v1786_v28, 0 }
 0xcae   : > { %2659 = vmatpush3.bf16.xpose.msra.mxu1 %v1791_v24 }
 0xcaf   : > { %2670 = vmatprep.subr.bf16.mxu1 %v3037_v2 }
 0xcb0   : > { %v1738_v29 = vpop.permute.xlu1 %1737 }
 0xcb1   : > { %v1743_v30 = vsel %vm1173_vm6, %v1738_v29, 0 }
 0xcb2   : > { %2653 = vmatpush3.bf16.xpose.msra.mxu0 %v1743_v30 }
 0xcb3   : > { %2664 = vmatprep.subr.bf16.mxu0 %v3037_v2 }
 0xcb5   : > { %2661 = vmatmul.mubr.msk.bf16.vlgmr.msra.gmra.mxu1 %vm1173_vm6, %v1736_v27 }
 0xcb6   : > { %2672 = vmatprep.mubr.msk.bf16.mxu1 %vm3040_vm0, %v3037_v2 }
 0xcb9   : > { %2655 = vmatmul.mubr.msk.bf16.vlgmr.msra.gmra.mxu0 %vm1173_vm6, %v1733_v22 }
 0xcba   : > { %2666 = vmatprep.mubr.msk.bf16.mxu0 %vm3040_vm0, %v3037_v2 }
 0xd75   : > { %v1827_v31 = vpop.f32.mrf.mxu1 }
 0xd76   : > { %v1836_v32 = vsel %vm1268_vm7, %v1827_v31, -inf }
 0xd77   : > { %1837 = vmax.xlane.f32.xlu0 %v1836_v32  ;;  %v2662_v33 = vpop.f32.mrf.mxu1 }
 0xd79   : > { %v1779_v34 = vpop.f32.mrf.mxu0  ;;  %v1830_v35 = vpop.f32.mrf.mxu1 }
 0xd7a   : > { %v1833_v36 = vsel %vm1268_vm7, %v1779_v34, -inf  ;;  %v2414_v35 = vld [vmem:[%s3551_s7 + $0x1] ss:$0 sm:$0xff] }
 0xd7b   : > { %1834 = vmax.xlane.f32.xlu1 %v1833_v36  ;;  %v2656_v37 = vpop.f32.mrf.mxu0  ;;  %v2663_v38 = vpop.f32.mrf.mxu1 }
 0xd7c   : > { %v2415_v37 = vld [vmem:[%s3552_s8 + $0x1] ss:$0 sm:$0xff] }
 0xd7d   : > { %v1782_v39 = vpop.f32.mrf.mxu0 }
 0xd7f   : > { %v2657_v40 = vpop.f32.mrf.mxu0 }
 0xe00   : > { %v1838_v41 = vpop.xlane.xlu0 %1837 }
 0xe01   : > { %v1840_v42 = vsub.f32 %v1827_v31, %v1838_v41  ;;  %v2821_v41 = vld [vmem:[%s3555_s11 + $0x28] sm:$0xff]  }
 0xe03   : > { %v1843_v43 = vmul.f32 1.442695, %v1840_v42  ;;  %v2822_v42 = vld [vmem:[%s3555_s11 + $0x20] sm:$0xff]  }
 0xe04   : > { %v1835_v44 = vpop.xlane.xlu1 %1834 }
 0xe05   : > { %2837 = vpow2.f32 %v1843_v43  ;;  %v1839_v45 = vsub.f32 %v1779_v34, %v1835_v44  ;;  %v2417_v43 = vld [vmem:[%s3554_s10 + $0x1] ss:$0 sm:$0xff] }
 0xe07   : > { %v1841_v46 = vmul.f32 1.442695, %v1839_v45 }
 0xe09   : > { %2839 = vpow2.f32 %v1841_v46 }
 0xe12   : > { %v2838_v47 = vpop.eup %2837 }
 0xe13   : > { %v1848_v48 = vsel %vm1268_vm7, %v2838_v47, 0.0 }
 0xe14   : > { %1849 = vadd.xlane.f32.xlu0 %v1848_v48 }
 0xe16   : > { %v2840_v49 = vpop.eup %2839 }
 0xe17   : > { %v1845_v50 = vsel %vm1268_vm7, %v2840_v49, 0.0 }
 0xe18   : > { %1846 = vadd.xlane.f32.xlu1 %v1845_v50 }
 0xe29   : > { %1857 = vrot.lane.b32.xlu1 %v1733_v22, %s3043_s30  ;;  %v2817_v22 = vld [vmem:[#allocation8 + $0x18] sm:$0xff]  }
 0xe2a   : > { %1905 = vrot.lane.b32.xlu0 %v1736_v27, %s3043_s30  ;;  %s2256_s30 = scalar_lea.hbm %s3593_s27, %s2441_s29 }
 0xe9d   : > { %v1850_v51 = vpop.xlane.xlu0 %1849 }
 0xe9e   : > { %2841 = vrcp.f32 %v1850_v51 }
 0xea1   : > { %v1847_v52 = vpop.xlane.xlu1 %1846  ;;  %v1906_v53 = vpop.permute.xlu0 %1905 }
 0xea2   : > { %2843 = vrcp.f32 %v1847_v52  ;;  %v1911_v54 = vsel %vm1298_vm8, %v1906_v53, 0 }
 0xea3   : > { %2671 = vmatpush3.bf16.msra.mxu1 %v1911_v54 }
 0xea4   : > { %2684 = vmatprep.subr.bf16.mxu1 %v3037_v2 }
 0xea5   : > { %v1858_v55 = vpop.permute.xlu1 %1857 }
 0xea6   : > { %v1863_v56 = vsel %vm1298_vm8, %v1858_v55, 0 }
 0xea7   : > { %2665 = vmatpush3.bf16.msra.mxu0 %v1863_v56 }
 0xea8   : > { %2676 = vmatprep.subr.bf16.mxu0 %v3037_v2 }
 0xeab   : > { %v2842_v57 = vpop.eup %2841 }
 0xeac   : > { %v1854_v58 = vmul.f32 %v2842_v57, %v2838_v47 }
 0xeae   : > { %v1856_v59 = vpack.c.bf16 %v1854_v58, %v1854_v58 }
 0xeaf   : > { %v2844_v60 = vpop.eup %2843 }
 0xeb0   : > { %2673 = vmatmul.mubr.msk.bf16.vlgmr.msra.gmra.mxu1 %vm1268_vm7, %v1856_v59  ;;  %v1853_v61 = vmul.f32 %v2844_v60, %v2840_v49 }
 0xeb1   : > { %2688 = vmatprep.mubr.msk.bf16.mxu1 %vm3040_vm0, %v3037_v2  ;;  %2685 = vmatpush3.bf16.msra.mxu1 %v2817_v22 }
 0xeb2   : > { %v1855_v62 = vpack.c.bf16 %v1853_v61, %v1853_v61  ;;  %2686 = vmatprep.subr.bf16.mxu1 %v3037_v2 }
 0xeb4   : > { %2667 = vmatmul.mubr.msk.bf16.vlgmr.msra.gmra.mxu0 %vm1268_vm7, %v1855_v62 }
 0xeb5   : > { %2680 = vmatprep.mubr.msk.bf16.mxu0 %vm3040_vm0, %v3037_v2  ;;  %2677 = vmatpush3.bf16.msra.mxu0 %v2815_v63 }
 0xeb6   : > { %2678 = vmatprep.subr.bf16.mxu0 %v3037_v2  ;;  %2687 = vmatpush3.bf16.msra.mxu1 %v2818_v23 }
 0xeb9   : > { %2679 = vmatpush3.bf16.msra.mxu0 %v2816_v0 }
 0xeba   : > { %2692 = vmatprep.subr.bf16.mxu0 %v3037_v2 }
 0xf70   : > { %v1947_v1 = vpop.f32.mrf.mxu1 }
 0xf71   : > { %1954 = vrot.lane.b32.xlu0 %v1947_v1, %s3044_s23  ;;  %s542_s23 = sand.u32 1, %s3017_s19  }
 0xf72   : > { %v2674_v3 = vpop.f32.mrf.mxu1  ;;  %s2370_s17 = sshll.u32 %s542_s23, 3  ;;  %s2245_s0 = scalar_lea.sflag [#allocation4], %s542_s23 }
 0xf73   : > { %s544_s26 = scalar_lea.vmem [#allocation10], %s2370_s17 }
 0xf74   : > { %v1899_v4 = vpop.f32.mrf.mxu0  ;;  %v1950_v5 = vpop.f32.mrf.mxu1  ;;  %s2258_s16 = sshll.u32 %s544_s26, 4  ;;  %s2259_s16 = int_to_ptr.vmem [resolvable:$true] %s2258_s16 }
 0xf75   : > { %s2953_s25 = scalar_lea.vmem %s2259_s16, 128  ;;  %p2960_p0 = scmp.lt.s32.totalorder %s2259_s16, %s2958_s18 }
 0xf76   : > { %v2668_v6 = vpop.f32.mrf.mxu0  ;;  %v2675_v7 = vpop.f32.mrf.mxu1  ;;  %p2954_p8 = scmp.ne.s32.totalorder %s2259_s16, %s2953_s25  ;;  %p2961_p2 = scmp.lt.s32.totalorder %s2959_s22, %s2953_s25 }
 0xf77   : > { %v2438_v7 = vld [vmem:[%s3557_s13 + $0x1] ss:$0 sm:$0xff] }
 0xf78   : > { %v1902_v8 = vpop.f32.mrf.mxu0  ;;  %p2955_p11 = pnand %p2954_p8, %p3164_p5  ;;  %p2962_p13 = por %p2961_p2, %p2960_p0 }
 0xf7a   : > { %v2669_v9 = vpop.f32.mrf.mxu0  ;;  %p2956_p1 = pneg %p2955_p11 }
 0xf7b   : > { %v2439_v9 = vld [vmem:[%s3558_s14 + $0x1] ss:$0 sm:$0xff] }
 0xf7c   : > { %p2963_p3 = pnand %p2962_p13, %p2956_p1 }
 0xfe3   : > { %v1955_v10 = vpop.permute.xlu0 %1954 }
 0xfe4   : > { %v1957_v11 = vsel %vm1173_vm6, %v1899_v4, %v1955_v10 }
 0xfe5   : > { %v1958_v12 = vpack.c.bf16 %v1957_v11, %v1957_v11 }
 0xfe7   : > { %2681 = vmatmul.mubr.msk.bf16.vlgmr.msra.gmra.mxu0 %vm586_vm5, %v1958_v12 }
 0xfe8   : > { %2700 = vmatprep.mubr.msk.bf16.mxu0 %vm3040_vm0, %v3037_v2 }
0x10a7   : > { %v2013_v13 = vpop.f32.mrf.mxu0 }
0x10a8   : > { %v2014_v14 = vadd.f32 %v2013_v13, %v3425_v19  ;;  %v2819_v19 = vld [vmem:[%s3555_s11 + $0x38] sm:$0xff]  }
0x10a9   : > { %v2682_v15 = vpop.f32.mrf.mxu0  ;;  %2693 = vmatpush3.bf16.msra.mxu0 %v2819_v19 }
0x10aa   : > { %v2023_v16 = vsel %vm586_vm5, %v2014_v14, 0.0  ;;  %v2027_v17 = vmul.f32 %v2014_v14, %v2014_v14  ;;  %2694 = vmatprep.subr.bf16.mxu0 %v3037_v2 }
0x10ab   : > { %2024 = vadd.xlane.f32.xlu1 %v2023_v16  ;;  %v2016_v18 = vpop.f32.mrf.mxu0 }
0x10ac   : > { %v2028_v20 = vsel %vm586_vm5, %v2027_v17, 0.0 }
0x10ad   : > { %2029 = vadd.xlane.f32.xlu0 %v2028_v20  ;;  %v2683_v21 = vpop.f32.mrf.mxu0  ;;  %2695 = vmatpush3.bf16.msra.mxu0 %v2820_v25 }
0x10ae   : > { %2696 = vmatprep.subr.bf16.mxu0 %v3037_v2 }
0x10b1   : > { %2697 = vmatpush3.bf16.msra.mxu0 %v2821_v41 }
0x10b2   : > { %2698 = vmatprep.subr.bf16.mxu0 %v3037_v2  ;;  %v2430_v2 = vld [vmem:[%s3556_s12 + $0x1] ss:$0 sm:$0xff] }
0x10b5   : > { %2699 = vmatpush3.bf16.msra.mxu0 %v2822_v42 }
0x1134   : > { %v2025_v26 = vpop.xlane.xlu1 %2024 }
0x1135   : > { %v2026_v27 = vmul.f32 0.03125, %v2025_v26 }
0x1136   : > { %v2030_v28 = vpop.xlane.xlu0 %2029 }
0x1137   : > { %v2032_v24 = vmul.f32 %v2026_v27, %v2026_v27  ;;  %v2031_v29 = vmul.f32 0.03125, %v2030_v28  ;;  %v2035_v33 = vsub.f32 %v2014_v14, %v2026_v27 }
0x1139   : > { %v2033_v30 = vsub.f32 %v2031_v29, %v2032_v24 }
0x113b   : > { %v2034_v31 = vmax.f32 %v2033_v30, 0.0 }
0x113d   : > { %v2036_v32 = vadd.f32 1e-06, %v2034_v31 }
0x113f   : > { %2845 = vrsqrt.f32 %v2036_v32 }
0x114c   : > { %v2846_v34 = vpop.eup %2845 }
0x114d   : > { %v2038_v36 = vmul.f32 %v2846_v34, %v2035_v33 }
0x114f   : > { %v2045_v38 = vmul.f32 %v2414_v35, %v2038_v36 }
0x1151   : > { %v2052_v39 = vadd.f32 %v2415_v37, %v2045_v38 }
0x1153   : > { %v2053_v40 = vpack.c.bf16 %v2052_v39, %v2052_v39 }
0x1155   : > { %2689 = vmatmul.mubr.msk.bf16.vlgmr.msra.gmra.mxu1 %vm586_vm5, %v2053_v40 }
0x1215   : > { %v2116_v44 = vpop.f32.mrf.mxu1 }
0x1216   : > { %v2117_v45 = vadd.f32 %v2417_v43, %v2116_v44 }
0x1217   : > { %v2690_v46 = vpop.f32.mrf.mxu1 }
0x1218   : > { %v2122_v47 = vmax.f32 %v2117_v45, 0.0 }
0x1219   : > { %v2119_v48 = vpop.f32.mrf.mxu1 }
0x121a   : > { %v2123_v49 = vpack.c.bf16 %v2122_v47, %v2122_v47 }
0x121b   : > { %v2691_v50 = vpop.f32.mrf.mxu1 }
0x121c   : > { %2701 = vmatmul.mubr.msk.bf16.vlgmr.msra.gmra.mxu0 %vm1595_vm9, %v2123_v49 }
0x12dc   : > { %v2202_v51 = vpop.f32.mrf.mxu0 }
0x12dd   : > { %v2203_v52 = vadd.f32 %v2430_v2, %v2202_v51 }
0x12de   : > { %v2702_v53 = vpop.f32.mrf.mxu0 }
0x12df   : > { %v2208_v54 = vadd.f32 %v2203_v52, %v2052_v39 }
0x12e0   : > { %v2205_v55 = vpop.f32.mrf.mxu0 }
0x12e1   : > { %v2213_v56 = vsel %vm586_vm5, %v2208_v54, 0.0  ;;  %v2217_v57 = vmul.f32 %v2208_v54, %v2208_v54 }
0x12e2   : > { %2214 = vadd.xlane.f32.xlu0 %v2213_v56  ;;  %v2703_v58 = vpop.f32.mrf.mxu0 }
0x12e3   : > { %v2218_v59 = vsel %vm586_vm5, %v2217_v57, 0.0 }
0x12e4   : > { %2219 = vadd.xlane.f32.xlu1 %v2218_v59 }
0x136b   : > { %v2215_v60 = vpop.xlane.xlu0 %2214 }
0x136c   : > { %v2216_v61 = vmul.f32 0.03125, %v2215_v60 }
0x136d   : > { %v2220_v62 = vpop.xlane.xlu1 %2219 }
0x136e   : > { %v2222_v63 = vmul.f32 %v2216_v61, %v2216_v61  ;;  %v2221_v0 = vmul.f32 0.03125, %v2220_v62  ;;  %v2225_v5 = vsub.f32 %v2208_v54, %v2216_v61 }
0x1370   : > { %v2223_v1 = vsub.f32 %v2221_v0, %v2222_v63 }
0x1372   : > { %v2224_v3 = vmax.f32 %v2223_v1, 0.0 }
0x1374   : > { %v2226_v4 = vadd.f32 1e-06, %v2224_v3 }
0x1376   : > { %2847 = vrsqrt.f32 %v2226_v4 }
0x1383   : > { %v2848_v6 = vpop.eup %2847 }
0x1384   : > { %v2228_v8 = vmul.f32 %v2848_v6, %v2225_v5 }
0x1386   : > { %v2235_v10 = vmul.f32 %v2438_v7, %v2228_v8 }
0x1388   : > { %v2242_v11 = vadd.f32 %v2439_v9, %v2235_v10 }
0x138a   : > { %2243 = vst.msk [vmem:[%s544_s26] sm:$0xff] %vm586_vm5, %v2242_v11 }
0x138b   : > { %2966 = shalt.err (!%p2963_p3)
}
0x138c   : > { %s2967_s17 = scalar_lea.hbm %s2256_s30, 128  ;;  %s2971_s29 = scalar_lea.hbm %s3593_s27, 256 }
0x138d   : > { %p2968_p9 = scmp.ne.s32.totalorder %s2256_s30, %s2967_s17  ;;  %p2972_p12 = scmp.lt.s32.totalorder %s2256_s30, %s3593_s27 }
0x138e   : > { %p2973_p10 = scmp.lt.s32.totalorder %s2971_s29, %s2967_s17 }
0x138f   : > { %p2969_p4 = pnand %p2968_p9, %p3164_p5 }
0x1390   : > { %p2974_p8 = por %p2973_p10, %p2972_p12 }
0x1391   : > { %p2970_p7 = pneg %p2969_p4 }
0x1393   : > { %p2975_p11 = pnand %p2974_p8, %p2970_p7 }
0x1395   : > { %2978 = shalt.err (!%p2975_p11)
}
0x1396   : > { %2720 = dma.vmem_to_hbm [thread:$0]  (%p3164_p5), %s2259_s16, 128, %s2256_s30, %s2245_s0  }
0x1397 PF: > { %s3594_s20 = sld [smem:[#allocation17_spill]] }
0x1398   : > { %s3595_s25 = sld [smem:[#allocation15_spill]] }
0x139d   : > { %p2747_p1 = scmp.ge.s32.totalorder %s3594_s20, 2 }
0x139e   : > { %s2270_s18 = sand.u32 1, %s3595_s25  }
0x139f   : > { %p2736_p0 = pnand %p2747_p1, %p3168_p6  ;;  %s2271_s22 = scalar_lea.sflag [#allocation4], %s2270_s18 }
0x13a1   : > { %p2737_p2 = pneg %p2736_p0 }
0x13a3   : > { %3008 = dma.done.wait (%p2737_p2), %s2271_s22, 128  }
0x13a4   : > { %3010 = vsyncadd (%p2737_p2), %s2271_s22, 4294967168  ;;  %s3597_s21 = sld [smem:[#allocation18_spill]]  ;;  %s3600_s18 = smov %s3017_s19 }
0x13a5   : > { %s3598_s17 = sld [smem:[#allocation16_spill]] }
0x13a6   : > { %s3599_s20 = sld [smem:[#allocation19_spill]] }
0x13aa   : > { %p28_p13 = scmp.ge.s32.totalorder %s3597_s21, 4  }
0x13ab   : > { %s3601_s19 = smov %s3598_s17 }
0x13ac   :  { %30 = sbr.rel (!%p28_p13) target bundleno = 9 (0x9), region = 142 }
0x13b1   :  { %2276 = vsyncpa [#allocation3], 1 }
0x13b2   :  { %2278 = vsyncpa [#allocation3 + $0x1], 1 }
0x13b3   :  { %2279 = vsyncpa [#allocation6], 1 }
0x13b4   :  { %2280 = vsyncpa [#allocation9], 1 }
0x13b5   :  { %2281 = vsyncpa [#allocation4], 1 }
0x13b6   :  { %2283 = vsyncpa [#allocation4 + $0x1], 1 }

</bundles_post_ra>
